<compile_context>
chip_gen: v6e
topology: v6e:2x2x1
jax: 0.10.0
libtpu: 0.0.40
codegen_flags: <defaults>
</compile_context>

<pallas_src>
import numpy as np
import jax
import jax.numpy as jnp
from jax.experimental import pallas as pl
from jax.experimental.pallas import tpu as pltpu

_VMEM = pl.BlockSpec(memory_space=pltpu.MemorySpace.VMEM)

_TOWER_KEYS = ("c1_w", "c1_b", "c2_w", "c2_b", "fc1_w", "fc1_b", "fc2_w", "fc2_b")


def _round_up_8(b):
    return max(8, ((b + 7) // 8) * 8)


# ----------------------------------------------------------------------------
# The fused Pallas kernel
# ----------------------------------------------------------------------------
def _fused_kernel(g_ref, pat_ref, w1_ref, b1_ref, w2_ref, b2_ref,
                  fc1w_ref, fc1b_ref, fc2w_ref, fc2b_ref,
                  c1w_ref, c1b_ref, chw_ref, chb_ref, c2w_ref, c2b_ref,
                  out_ref):
    f32, bf16 = jnp.float32, jnp.bfloat16
    n = pat_ref.shape[1]            # B * 64 conv1-output rows per tower
    bp = out_ref.shape[1]           # Bpad (batch rows padded to multiple of 8)
    m = n - 24                      # number of valid pool-window anchor rows kept
    g = g_ref[...]                  # (9*Bpad, m) one-hot bf16 pool gather

    xs = []
    for t in range(2):              # tower 0 = img1, tower 1 = img2 (unrolled)
        # ---- conv1 (one matmul over prebuilt im2col patches) + bias + ReLU --
        y1 = jnp.dot(pat_ref[t], w1_ref[t], preferred_element_type=f32)
        y1 = jnp.maximum(y1 + b1_ref[t], 0.0)                    # (n, 32) f32

        # ---- maxpool 3x3/s2 over the 8x8 map, entirely at value level ------
        # r1[i] = max(y1[i], y1[i+1], y1[i+2]) ; r2[i] = max over the full 3x3
        # window anchored at flat row i (rows are b*64 + oh*8 + ow).
        r1 = jnp.maximum(jnp.maximum(y1[0:n - 2], y1[1:n - 1]), y1[2:n])
        r2 = jnp.maximum(jnp.maximum(r1[0:m], r1[8:8 + m]), r1[16:16 + m])

        # ---- gather the 9 pooled locations per batch row with one one-hot
        #      matmul (exact: 1.0 * bf16 value, f32 accumulate) ---------------
        pooled = jnp.dot(g, r2.astype(bf16), preferred_element_type=f32)
        pooled = pooled.astype(bf16)                             # (9*bp, 32)

        # ---- conv2: all 9 taps in ONE lane-dense matmul; each tap lives in
        #      its own 128-lane block of the packed weight.  Accumulate the
        #      valid (tap, output-position) pairs with full-vreg adds, fuse
        #      bias + ReLU + the 3x3 maxpool (output spatial 1x1 => running
        #      max over the 9 output positions). ------------------------------
        z = jnp.dot(pooled, w2_ref[t], preferred_element_type=f32)   # (9*bp, 1152)
        bias2 = b2_ref[t]                                            # (1, 128)
        feat = None
        for oh in range(3):
            for ow in range(3):
                acc = jnp.zeros((bp, 128), f32)
                for kh in range(3):
                    for kw in range(3):
                        ih, iw = 2 * oh + kh - 2, 2 * ow + kw - 2    # padding = 2
                        if 0 <= ih <= 2 and 0 <= iw <= 2:
                            loc, k = ih * 3 + iw, kh * 3 + kw
                            acc = acc + z[loc * bp:(loc + 1) * bp,
                                          k * 128:(k + 1) * 128]
                pos = jnp.maximum(acc + bias2, 0.0)
                feat = pos if feat is None else jnp.maximum(feat, pos)
        # feat: (bp, 128) f32; lanes >= 64 are exactly 0, rows >= B are junk.

        # ---- fc1 -> fc2 (no ReLU in between, matching the reference) --------
        h = jnp.dot(feat.astype(bf16), fc1w_ref[t],
                    preferred_element_type=f32) + fc1b_ref[t]
        x = jnp.dot(h.astype(bf16), fc2w_ref[t],
                    preferred_element_type=f32) + fc2b_ref[t]        # (bp, 128)
        xs.append(x)
        out_ref[t] = x                                               # lanes 0..9 real

    # ---- comparison head: one lane-concatenated 256-K layer, then 2 more ----
    cat = jnp.concatenate(xs, axis=1).astype(bf16)                   # (bp, 256)
    zc = jnp.dot(cat, c1w_ref[...], preferred_element_type=f32) + c1b_ref[...]
    zc = jnp.maximum(zc, 0.0)
    zc = jnp.dot(zc.astype(bf16), chw_ref[...],
                 preferred_element_type=f32) + chb_ref[...]
    zc = jnp.maximum(zc, 0.0)
    zc = jnp.dot(zc.astype(bf16), c2w_ref[...],
                 preferred_element_type=f32) + c2b_ref[...]
    out_ref[2] = zc                                                  # lanes 0..1 real


def _fused_call(g, patches, tp, hp):
    bpad = g.shape[0] // 9
    return pl.pallas_call(
        _fused_kernel,
        out_shape=jax.ShapeDtypeStruct((3, bpad, 128), jnp.float32),
        in_specs=[_VMEM] * 16,
        out_specs=_VMEM,
        compiler_params=pltpu.CompilerParams(vmem_limit_bytes=32 * 1024 * 1024),
    )(g, patches, tp["w1"], tp["b1"], tp["w2"], tp["b2"],
      tp["fc1w"], tp["fc1b"], tp["fc2w"], tp["fc2b"],
      hp["c1w"], hp["c1b"], hp["chw"], hp["chb"], hp["c2w"], hp["c2b"])


# ----------------------------------------------------------------------------
# Parameters: synthetic init in torch-like layout + one-time layout prep
# ----------------------------------------------------------------------------
def init_params(nb_hidden, key):
    keys = jax.random.split(key, 26)
    it = iter(keys)

    def u(shape, fan_in):
        bound = 1.0 / np.sqrt(fan_in)
        return jax.random.uniform(next(it), shape, jnp.float32, -bound, bound)

    p = {}
    p["c1_w"], p["c1_b"] = u((32, 1, 3, 3), 9), u((32,), 9)
    p["c2_w"], p["c2_b"] = u((64, 32, 3, 3), 288), u((64,), 288)
    p["fc1_w"], p["fc1_b"] = u((64, nb_hidden), 64), u((nb_hidden,), 64)   # (in,out)
    p["fc2_w"], p["fc2_b"] = u((nb_hidden, 10), nb_hidden), u((10,), nb_hidden)
    p["c1_w_n"], p["c1_b_n"] = u((32, 1, 3, 3), 9), u((32,), 9)
    p["c2_w_n"], p["c2_b_n"] = u((64, 32, 3, 3), 288), u((64,), 288)
    p["fc1_w_n"], p["fc1_b_n"] = u((64, nb_hidden), 64), u((nb_hidden,), 64)
    p["fc2_w_n"], p["fc2_b_n"] = u((nb_hidden, 10), nb_hidden), u((10,), nb_hidden)
    p["comp1_w"], p["comp1_b"] = u((20, 100), 20), u((100,), 20)
    p["comph_w"], p["comph_b"] = u((100, 100), 100), u((100,), 100)
    p["comp2_w"], p["comp2_b"] = u((100, 2), 100), u((2,), 100)
    return p


def prepare_params(p, nb_hidden):
    """All weight layout work is done here, once (nothing per-forward)."""
    assert 1 <= nb_hidden <= 128, "this packing assumes nb_hidden <= 128"
    H = nb_hidden
    bf16, f32 = jnp.bfloat16, jnp.float32

    def conv1_mat(w):            # (32,1,3,3) -> (16,32); K index = kh*3+kw, pad 9->16
        return jnp.pad(w.reshape(32, 9).T, ((0, 7), (0, 0))).astype(bf16)

    def conv2_flat(w):           # (64,32,3,3) -> (32, 9*128); tap kh*3+kw in its own
        m = jnp.transpose(w, (1, 2, 3, 0)).reshape(32, 9, 64)     # 128-lane block
        m = jnp.pad(m, ((0, 0), (0, 0), (0, 64)))
        return m.reshape(32, 9 * 128).astype(bf16)

    def pad2d(m, rows, cols):
        return jnp.pad(m, ((0, rows - m.shape[0]), (0, cols - m.shape[1])))

    def row_pad(v, cols):
        return jnp.pad(v.reshape(1, -1), ((0, 0), (0, cols - v.shape[0]))).astype(f32)

    def tower_stack(q1, q2):     # q1 -> img1 weights, q2 -> img2 weights
        pair = (q1, q2)
        return {
            "w1":   jnp.stack([conv1_mat(q["c1_w"]) for q in pair]),
            "b1":   jnp.stack([q["c1_b"].reshape(1, 32).astype(f32) for q in pair]),
            "w2":   jnp.stack([conv2_flat(q["c2_w"]) for q in pair]),
            "b2":   jnp.stack([row_pad(q["c2_b"], 128) for q in pair]),
            "fc1w": jnp.stack([pad2d(q["fc1_w"], 128, 128).astype(bf16) for q in pair]),
            "fc1b": jnp.stack([row_pad(q["fc1_b"], 128) for q in pair]),
            "fc2w": jnp.stack([pad2d(q["fc2_w"], 128, 128).astype(bf16) for q in pair]),
            "fc2b": jnp.stack([row_pad(q["fc2_b"], 128) for q in pair]),
        }

    shared = {k: p[k] for k in _TOWER_KEYS}
    nows = {k: p[k + "_n"] for k in _TOWER_KEYS}

    # head layer-1 weight laid out for the lane-concatenated (Bpad, 256) input:
    # rows 0..9 act on x1 lanes 0..9, rows 128..137 act on x2 lanes 0..9.
    c1w = jnp.zeros((256, 128), f32)
    c1w = c1w.at[0:10, 0:100].set(p["comp1_w"][0:10])
    c1w = c1w.at[128:138, 0:100].set(p["comp1_w"][10:20])
    head = {
        "c1w": c1w.astype(bf16),
        "c1b": row_pad(p["comp1_b"], 128),
        "chw": pad2d(p["comph_w"], 128, 128).astype(bf16),
        "chb": row_pad(p["comph_b"], 128),
        "c2w": pad2d(p["comp2_w"], 128, 128).astype(bf16),
        "c2b": row_pad(p["comp2_b"], 128),
    }
    return {"tower": {"weight_sharing": tower_stack(shared, shared),
                      "no_weight_sharing": tower_stack(shared, nows)},
            "head": head}


# ----------------------------------------------------------------------------
# Forward pass (mirrors Conv_Net.forward)
# ----------------------------------------------------------------------------
def _conv1_patches(x):
    """(B,2,14,14) NCHW pairs -> (2, B*64, 16) bf16 im2col patches for conv1
    (k=3, s=2, pad=2; K order = kh*3+kw, zero-padded 9 -> 16)."""
    B = x.shape[0]
    imgs = jnp.transpose(x, (1, 0, 2, 3))                        # (2, B, 14, 14)
    xp = jnp.pad(imgs, ((0, 0), (0, 0), (2, 2), (2, 2)))         # (2, B, 18, 18)
    cols = [xp[:, :, kh:kh + 15:2, kw:kw + 15:2]                 # each (2, B, 8, 8)
            for kh in range(3) for kw in range(3)]
    patches = jnp.stack(cols, axis=-1).reshape(2, B * 64, 9)
    patches = jnp.pad(patches, ((0, 0), (0, 0), (0, 7)))
    return patches.astype(jnp.bfloat16)


def _pool_gather_matrix(B):
    """One-hot (9*Bpad, 64*B - 24) matrix selecting, for each (pool loc, b),
    the row of the window-max map r2 that holds pool1[b, ph, pw, :]."""
    n = 64 * B
    bpad = _round_up_8(B)
    g = np.zeros((9 * bpad, n - 24), np.float32)
    for b in range(B):
        for ph in range(3):
            for pw in range(3):
                g[(ph * 3 + pw) * bpad + b, b * 64 + 16 * ph + 2 * pw] = 1.0
    return g


@jax.jit
def _forward_pallas(tower_params, head_params, train_input):
    x = train_input.astype(jnp.float32)
    B = x.shape[0]
    patches = _conv1_patches(x)                                  # (2, B*64, 16) bf16
    g = jnp.asarray(_pool_gather_matrix(B), jnp.bfloat16)        # trace-time constant
    out = _fused_call(g, patches, tower_params, head_params)     # (3, Bpad, 128) f32
    return out[0, :B, :10], out[1, :B, :10], out[2, :B, :2]


def conv_net_forward(prepared, option_ws, train_input):
    if option_ws not in ("weight_sharing", "no_weight_sharing"):
        # mirrors the nn.Module's error-string branch
        return ("Please choose the type of convolutional network you would like to use: "
                "'weight_sharing' or 'no_weight_sharing'.")
    return _forward_pallas(prepared["tower"][option_ws], prepared["head"], train_input)


# ----------------------------------------------------------------------------
# Pure-JAX reference (numerical sanity check of the fused kernel)
# ----------------------------------------------------------------------------
def _rbf(x):
    return x.astype(jnp.bfloat16).astype(jnp.float32)


def _ref_conv_relu(x, w, b, stride=2, pad=2):
    y = jax.lax.conv_general_dilated(
        _rbf(x), _rbf(jnp.transpose(w, (2, 3, 1, 0))),
        window_strides=(stride, stride), padding=[(pad, pad), (pad, pad)],
        dimension_numbers=("NHWC", "HWIO", "NHWC"))
    return jnp.maximum(y + b.reshape(1, 1, 1, -1), 0.0)


def _ref_pool(x, k=3, s=2):
    return jax.lax.reduce_window(x, -jnp.inf, jax.lax.max,
                                 (1, k, k, 1), (1, s, s, 1), "VALID")


def _ref_tower(img_nhwc, q):
    y = _ref_pool(_ref_conv_relu(img_nhwc, q["c1_w"], q["c1_b"]))
    y = _ref_pool(_ref_conv_relu(y, q["c2_w"], q["c2_b"]))
    y = y.reshape(y.shape[0], -1)
    y = jnp.dot(_rbf(y), _rbf(q["fc1_w"])) + q["fc1_b"]
    return jnp.dot(_rbf(y), _rbf(q["fc2_w"])) + q["fc2_b"]


def reference_forward(raw, option_ws, train_input):
    x = train_input.astype(jnp.float32)
    img1 = jnp.transpose(x[:, 0:1], (0, 2, 3, 1))
    img2 = jnp.transpose(x[:, 1:2], (0, 2, 3, 1))
    shared = {k: raw[k] for k in _TOWER_KEYS}
    second = shared if option_ws == "weight_sharing" else {k: raw[k + "_n"] for k in _TOWER_KEYS}
    x1 = _ref_tower(img1, shared)
    x2 = _ref_tower(img2, second)
    z = jnp.concatenate([x1, x2], axis=1)
    z = jnp.maximum(jnp.dot(_rbf(z), _rbf(raw["comp1_w"])) + raw["comp1_b"], 0.0)
    z = jnp.maximum(jnp.dot(_rbf(z), _rbf(raw["comph_w"])) + raw["comph_b"], 0.0)
    z = jnp.dot(_rbf(z), _rbf(raw["comp2_w"])) + raw["comp2_b"]
    return x1, x2, z


if __name__ == "__main__":
    key = jax.random.PRNGKey(0)
    k_param, k_input = jax.random.split(key)
    nb_hidden = 32
    raw_params = init_params(nb_hidden, k_param)
    prepared = prepare_params(raw_params, nb_hidden)
    # MNIST-pairs style input: batch=2, two stacked 14x14 grayscale images (NCHW)
    train_input = jax.random.normal(k_input, (2, 2, 14, 14), dtype=jnp.float32)

    for opt in ("weight_sharing", "no_weight_sharing"):
        x1, x2, z = conv_net_forward(prepared, opt, train_input)
        jax.block_until_ready((x1, x2, z))
        assert x1.shape == (2, 10) and x1.dtype == jnp.float32
        assert x2.shape == (2, 10) and x2.dtype == jnp.float32
        assert z.shape == (2, 2) and z.dtype == jnp.float32
        # numerical check vs. a pure-JAX reference (loose tol: bf16 matmul operands)
        rx1, rx2, rz = reference_forward(raw_params, opt, train_input)
        np.testing.assert_allclose(np.asarray(x1), np.asarray(rx1), rtol=2e-2, atol=2e-2)
        np.testing.assert_allclose(np.asarray(x2), np.asarray(rx2), rtol=2e-2, atol=2e-2)
        np.testing.assert_allclose(np.asarray(z), np.asarray(rz), rtol=2e-2, atol=2e-2)

    # invalid-option branch mirrors the nn.Module's error string
    assert isinstance(conv_net_forward(prepared, "bogus", train_input), str)

    print("KERNEL_OK")
</pallas_src>

<mosaic_0001>
module attributes {stable_mosaic.version = 11 : i64} {
  func.func @_fused_kernel(%arg0: memref<72x104xbf16, #tpu.memory_space<vmem>>, %arg1: memref<2x128x16xbf16, #tpu.memory_space<vmem>>, %arg2: memref<2x16x32xbf16, #tpu.memory_space<vmem>>, %arg3: memref<2x1x32xf32, #tpu.memory_space<vmem>>, %arg4: memref<2x32x1152xbf16, #tpu.memory_space<vmem>>, %arg5: memref<2x1x128xf32, #tpu.memory_space<vmem>>, %arg6: memref<2x128x128xbf16, #tpu.memory_space<vmem>>, %arg7: memref<2x1x128xf32, #tpu.memory_space<vmem>>, %arg8: memref<2x128x128xbf16, #tpu.memory_space<vmem>>, %arg9: memref<2x1x128xf32, #tpu.memory_space<vmem>>, %arg10: memref<256x128xbf16, #tpu.memory_space<vmem>>, %arg11: memref<1x128xf32, #tpu.memory_space<vmem>>, %arg12: memref<128x128xbf16, #tpu.memory_space<vmem>>, %arg13: memref<1x128xf32, #tpu.memory_space<vmem>>, %arg14: memref<128x128xbf16, #tpu.memory_space<vmem>>, %arg15: memref<1x128xf32, #tpu.memory_space<vmem>>, %arg16: memref<3x8x128xf32, #tpu.memory_space<vmem>>) attributes {dimension_semantics = [], scalar_prefetch = 0 : i64, scratch_operands = 0 : i64, tpu.core_type = #tpu.core_type<tc>} {
    %c0 = arith.constant 0 : index
    %c0_0 = arith.constant 0 : index
    %0 = vector.load %arg0[%c0, %c0_0] : memref<72x104xbf16, #tpu.memory_space<vmem>>, vector<72x104xbf16>
    %c0_1 = arith.constant 0 : index
    %c0_2 = arith.constant 0 : index
    %c0_3 = arith.constant 0 : index
    %1 = vector.load %arg1[%c0_1, %c0_2, %c0_3] : memref<2x128x16xbf16, #tpu.memory_space<vmem>>, vector<1x128x16xbf16>
    %2 = vector.shape_cast %1 : vector<1x128x16xbf16> to vector<128x16xbf16>
    %c0_4 = arith.constant 0 : index
    %c0_5 = arith.constant 0 : index
    %c0_6 = arith.constant 0 : index
    %3 = vector.load %arg2[%c0_4, %c0_5, %c0_6] : memref<2x16x32xbf16, #tpu.memory_space<vmem>>, vector<1x16x32xbf16>
    %4 = vector.shape_cast %3 : vector<1x16x32xbf16> to vector<16x32xbf16>
    %cst = arith.constant dense<0.000000e+00> : vector<128x32xf32>
    %5 = tpu.matmul %2, %4, %cst {dimension_numbers = #tpu.dot_dimension_numbers<[1], [0], [0], [1], [0, 0, 1, 1], [], []>} : vector<128x16xbf16>, vector<16x32xbf16>, vector<128x32xf32> -> vector<128x32xf32>
    %c0_7 = arith.constant 0 : index
    %c0_8 = arith.constant 0 : index
    %c0_9 = arith.constant 0 : index
    %6 = vector.load %arg3[%c0_7, %c0_8, %c0_9] : memref<2x1x32xf32, #tpu.memory_space<vmem>>, vector<1x1x32xf32>
    %7 = vector.shape_cast %6 : vector<1x1x32xf32> to vector<1x32xf32>
    %8 = vector.broadcast %7 : vector<1x32xf32> to vector<128x32xf32>
    %9 = arith.addf %5, %8 : vector<128x32xf32>
    %cst_10 = arith.constant 0.000000e+00 : f32
    %10 = vector.broadcast %cst_10 : f32 to vector<128x32xf32>
    %11 = arith.maximumf %9, %10 : vector<128x32xf32>
    %12 = vector.extract_strided_slice %11 {offsets = [0, 0], sizes = [126, 32], strides = [1, 1]} : vector<128x32xf32> to vector<126x32xf32>
    %13 = vector.extract_strided_slice %11 {offsets = [1, 0], sizes = [126, 32], strides = [1, 1]} : vector<128x32xf32> to vector<126x32xf32>
    %14 = arith.maximumf %12, %13 : vector<126x32xf32>
    %15 = vector.extract_strided_slice %11 {offsets = [2, 0], sizes = [126, 32], strides = [1, 1]} : vector<128x32xf32> to vector<126x32xf32>
    %16 = arith.maximumf %14, %15 : vector<126x32xf32>
    %17 = vector.extract_strided_slice %16 {offsets = [0, 0], sizes = [104, 32], strides = [1, 1]} : vector<126x32xf32> to vector<104x32xf32>
    %18 = vector.extract_strided_slice %16 {offsets = [8, 0], sizes = [104, 32], strides = [1, 1]} : vector<126x32xf32> to vector<104x32xf32>
    %19 = arith.maximumf %17, %18 : vector<104x32xf32>
    %20 = vector.extract_strided_slice %16 {offsets = [16, 0], sizes = [104, 32], strides = [1, 1]} : vector<126x32xf32> to vector<104x32xf32>
    %21 = arith.maximumf %19, %20 : vector<104x32xf32>
    %22 = arith.truncf %21 : vector<104x32xf32> to vector<104x32xbf16>
    %cst_11 = arith.constant dense<0.000000e+00> : vector<72x32xf32>
    %23 = tpu.matmul %0, %22, %cst_11 {dimension_numbers = #tpu.dot_dimension_numbers<[1], [0], [0], [1], [0, 0, 1, 1], [], []>} : vector<72x104xbf16>, vector<104x32xbf16>, vector<72x32xf32> -> vector<72x32xf32>
    %24 = arith.truncf %23 : vector<72x32xf32> to vector<72x32xbf16>
    %c0_12 = arith.constant 0 : index
    %c0_13 = arith.constant 0 : index
    %c0_14 = arith.constant 0 : index
    %25 = vector.load %arg4[%c0_12, %c0_13, %c0_14] : memref<2x32x1152xbf16, #tpu.memory_space<vmem>>, vector<1x32x1152xbf16>
    %26 = vector.shape_cast %25 : vector<1x32x1152xbf16> to vector<32x1152xbf16>
    %cst_15 = arith.constant dense<0.000000e+00> : vector<72x1152xf32>
    %27 = tpu.matmul %24, %26, %cst_15 {dimension_numbers = #tpu.dot_dimension_numbers<[1], [0], [0], [1], [0, 0, 1, 1], [], []>} : vector<72x32xbf16>, vector<32x1152xbf16>, vector<72x1152xf32> -> vector<72x1152xf32>
    %c0_16 = arith.constant 0 : index
    %c0_17 = arith.constant 0 : index
    %c0_18 = arith.constant 0 : index
    %28 = vector.load %arg5[%c0_16, %c0_17, %c0_18] : memref<2x1x128xf32, #tpu.memory_space<vmem>>, vector<1x1x128xf32>
    %29 = vector.shape_cast %28 : vector<1x1x128xf32> to vector<1x128xf32>
    %cst_19 = arith.constant 0.000000e+00 : f32
    %30 = vector.broadcast %cst_19 : f32 to vector<8x128xf32>
    %31 = vector.extract_strided_slice %27 {offsets = [0, 1024], sizes = [8, 128], strides = [1, 1]} : vector<72x1152xf32> to vector<8x128xf32>
    %32 = arith.addf %30, %31 : vector<8x128xf32>
    %33 = vector.broadcast %29 : vector<1x128xf32> to vector<8x128xf32>
    %34 = arith.addf %32, %33 : vector<8x128xf32>
    %cst_20 = arith.constant 0.000000e+00 : f32
    %35 = vector.broadcast %cst_20 : f32 to vector<8x128xf32>
    %36 = arith.maximumf %34, %35 : vector<8x128xf32>
    %cst_21 = arith.constant 0.000000e+00 : f32
    %37 = vector.broadcast %cst_21 : f32 to vector<8x128xf32>
    %38 = vector.extract_strided_slice %27 {offsets = [0, 768], sizes = [8, 128], strides = [1, 1]} : vector<72x1152xf32> to vector<8x128xf32>
    %39 = arith.addf %37, %38 : vector<8x128xf32>
    %40 = vector.extract_strided_slice %27 {offsets = [8, 896], sizes = [8, 128], strides = [1, 1]} : vector<72x1152xf32> to vector<8x128xf32>
    %41 = arith.addf %39, %40 : vector<8x128xf32>
    %42 = vector.extract_strided_slice %27 {offsets = [16, 1024], sizes = [8, 128], strides = [1, 1]} : vector<72x1152xf32> to vector<8x128xf32>
    %43 = arith.addf %41, %42 : vector<8x128xf32>
    %44 = vector.broadcast %29 : vector<1x128xf32> to vector<8x128xf32>
    %45 = arith.addf %43, %44 : vector<8x128xf32>
    %cst_22 = arith.constant 0.000000e+00 : f32
    %46 = vector.broadcast %cst_22 : f32 to vector<8x128xf32>
    %47 = arith.maximumf %45, %46 : vector<8x128xf32>
    %48 = arith.maximumf %36, %47 : vector<8x128xf32>
    %cst_23 = arith.constant 0.000000e+00 : f32
    %49 = vector.broadcast %cst_23 : f32 to vector<8x128xf32>
    %50 = vector.extract_strided_slice %27 {offsets = [16, 768], sizes = [8, 128], strides = [1, 1]} : vector<72x1152xf32> to vector<8x128xf32>
    %51 = arith.addf %49, %50 : vector<8x128xf32>
    %52 = vector.broadcast %29 : vector<1x128xf32> to vector<8x128xf32>
    %53 = arith.addf %51, %52 : vector<8x128xf32>
    %cst_24 = arith.constant 0.000000e+00 : f32
    %54 = vector.broadcast %cst_24 : f32 to vector<8x128xf32>
    %55 = arith.maximumf %53, %54 : vector<8x128xf32>
    %56 = arith.maximumf %48, %55 : vector<8x128xf32>
    %cst_25 = arith.constant 0.000000e+00 : f32
    %57 = vector.broadcast %cst_25 : f32 to vector<8x128xf32>
    %58 = vector.extract_strided_slice %27 {offsets = [0, 256], sizes = [8, 128], strides = [1, 1]} : vector<72x1152xf32> to vector<8x128xf32>
    %59 = arith.addf %57, %58 : vector<8x128xf32>
    %60 = vector.extract_strided_slice %27 {offsets = [24, 640], sizes = [8, 128], strides = [1, 1]} : vector<72x1152xf32> to vector<8x128xf32>
    %61 = arith.addf %59, %60 : vector<8x128xf32>
    %62 = vector.extract_strided_slice %27 {offsets = [48, 1024], sizes = [8, 128], strides = [1, 1]} : vector<72x1152xf32> to vector<8x128xf32>
    %63 = arith.addf %61, %62 : vector<8x128xf32>
    %64 = vector.broadcast %29 : vector<1x128xf32> to vector<8x128xf32>
    %65 = arith.addf %63, %64 : vector<8x128xf32>
    %cst_26 = arith.constant 0.000000e+00 : f32
    %66 = vector.broadcast %cst_26 : f32 to vector<8x128xf32>
    %67 = arith.maximumf %65, %66 : vector<8x128xf32>
    %68 = arith.maximumf %56, %67 : vector<8x128xf32>
    %cst_27 = arith.constant 0.000000e+00 : f32
    %69 = vector.broadcast %cst_27 : f32 to vector<8x128xf32>
    %70 = vector.extract_strided_slice %27 {offsets = [0, 0], sizes = [8, 128], strides = [1, 1]} : vector<72x1152xf32> to vector<8x128xf32>
    %71 = arith.addf %69, %70 : vector<8x128xf32>
    %72 = vector.extract_strided_slice %27 {offsets = [8, 128], sizes = [8, 128], strides = [1, 1]} : vector<72x1152xf32> to vector<8x128xf32>
    %73 = arith.addf %71, %72 : vector<8x128xf32>
    %74 = vector.extract_strided_slice %27 {offsets = [16, 256], sizes = [8, 128], strides = [1, 1]} : vector<72x1152xf32> to vector<8x128xf32>
    %75 = arith.addf %73, %74 : vector<8x128xf32>
    %76 = vector.extract_strided_slice %27 {offsets = [24, 384], sizes = [8, 128], strides = [1, 1]} : vector<72x1152xf32> to vector<8x128xf32>
    %77 = arith.addf %75, %76 : vector<8x128xf32>
    %78 = vector.extract_strided_slice %27 {offsets = [32, 512], sizes = [8, 128], strides = [1, 1]} : vector<72x1152xf32> to vector<8x128xf32>
    %79 = arith.addf %77, %78 : vector<8x128xf32>
    %80 = vector.extract_strided_slice %27 {offsets = [40, 640], sizes = [8, 128], strides = [1, 1]} : vector<72x1152xf32> to vector<8x128xf32>
    %81 = arith.addf %79, %80 : vector<8x128xf32>
    %82 = vector.extract_strided_slice %27 {offsets = [48, 768], sizes = [8, 128], strides = [1, 1]} : vector<72x1152xf32> to vector<8x128xf32>
    %83 = arith.addf %81, %82 : vector<8x128xf32>
    %84 = vector.extract_strided_slice %27 {offsets = [56, 896], sizes = [8, 128], strides = [1, 1]} : vector<72x1152xf32> to vector<8x128xf32>
    %85 = arith.addf %83, %84 : vector<8x128xf32>
    %86 = vector.extract_strided_slice %27 {offsets = [64, 1024], sizes = [8, 128], strides = [1, 1]} : vector<72x1152xf32> to vector<8x128xf32>
    %87 = arith.addf %85, %86 : vector<8x128xf32>
    %88 = vector.broadcast %29 : vector<1x128xf32> to vector<8x128xf32>
    %89 = arith.addf %87, %88 : vector<8x128xf32>
    %cst_28 = arith.constant 0.000000e+00 : f32
    %90 = vector.broadcast %cst_28 : f32 to vector<8x128xf32>
    %91 = arith.maximumf %89, %90 : vector<8x128xf32>
    %92 = arith.maximumf %68, %91 : vector<8x128xf32>
    %cst_29 = arith.constant 0.000000e+00 : f32
    %93 = vector.broadcast %cst_29 : f32 to vector<8x128xf32>
    %94 = vector.extract_strided_slice %27 {offsets = [16, 0], sizes = [8, 128], strides = [1, 1]} : vector<72x1152xf32> to vector<8x128xf32>
    %95 = arith.addf %93, %94 : vector<8x128xf32>
    %96 = vector.extract_strided_slice %27 {offsets = [40, 384], sizes = [8, 128], strides = [1, 1]} : vector<72x1152xf32> to vector<8x128xf32>
    %97 = arith.addf %95, %96 : vector<8x128xf32>
    %98 = vector.extract_strided_slice %27 {offsets = [64, 768], sizes = [8, 128], strides = [1, 1]} : vector<72x1152xf32> to vector<8x128xf32>
    %99 = arith.addf %97, %98 : vector<8x128xf32>
    %100 = vector.broadcast %29 : vector<1x128xf32> to vector<8x128xf32>
    %101 = arith.addf %99, %100 : vector<8x128xf32>
    %cst_30 = arith.constant 0.000000e+00 : f32
    %102 = vector.broadcast %cst_30 : f32 to vector<8x128xf32>
    %103 = arith.maximumf %101, %102 : vector<8x128xf32>
    %104 = arith.maximumf %92, %103 : vector<8x128xf32>
    %cst_31 = arith.constant 0.000000e+00 : f32
    %105 = vector.broadcast %cst_31 : f32 to vector<8x128xf32>
    %106 = vector.extract_strided_slice %27 {offsets = [48, 256], sizes = [8, 128], strides = [1, 1]} : vector<72x1152xf32> to vector<8x128xf32>
    %107 = arith.addf %105, %106 : vector<8x128xf32>
    %108 = vector.broadcast %29 : vector<1x128xf32> to vector<8x128xf32>
    %109 = arith.addf %107, %108 : vector<8x128xf32>
    %cst_32 = arith.constant 0.000000e+00 : f32
    %110 = vector.broadcast %cst_32 : f32 to vector<8x128xf32>
    %111 = arith.maximumf %109, %110 : vector<8x128xf32>
    %112 = arith.maximumf %104, %111 : vector<8x128xf32>
    %cst_33 = arith.constant 0.000000e+00 : f32
    %113 = vector.broadcast %cst_33 : f32 to vector<8x128xf32>
    %114 = vector.extract_strided_slice %27 {offsets = [48, 0], sizes = [8, 128], strides = [1, 1]} : vector<72x1152xf32> to vector<8x128xf32>
    %115 = arith.addf %113, %114 : vector<8x128xf32>
    %116 = vector.extract_strided_slice %27 {offsets = [56, 128], sizes = [8, 128], strides = [1, 1]} : vector<72x1152xf32> to vector<8x128xf32>
    %117 = arith.addf %115, %116 : vector<8x128xf32>
    %118 = vector.extract_strided_slice %27 {offsets = [64, 256], sizes = [8, 128], strides = [1, 1]} : vector<72x1152xf32> to vector<8x128xf32>
    %119 = arith.addf %117, %118 : vector<8x128xf32>
    %120 = vector.broadcast %29 : vector<1x128xf32> to vector<8x128xf32>
    %121 = arith.addf %119, %120 : vector<8x128xf32>
    %cst_34 = arith.constant 0.000000e+00 : f32
    %122 = vector.broadcast %cst_34 : f32 to vector<8x128xf32>
    %123 = arith.maximumf %121, %122 : vector<8x128xf32>
    %124 = arith.maximumf %112, %123 : vector<8x128xf32>
    %cst_35 = arith.constant 0.000000e+00 : f32
    %125 = vector.broadcast %cst_35 : f32 to vector<8x128xf32>
    %126 = vector.extract_strided_slice %27 {offsets = [64, 0], sizes = [8, 128], strides = [1, 1]} : vector<72x1152xf32> to vector<8x128xf32>
    %127 = arith.addf %125, %126 : vector<8x128xf32>
    %128 = vector.broadcast %29 : vector<1x128xf32> to vector<8x128xf32>
    %129 = arith.addf %127, %128 : vector<8x128xf32>
    %cst_36 = arith.constant 0.000000e+00 : f32
    %130 = vector.broadcast %cst_36 : f32 to vector<8x128xf32>
    %131 = arith.maximumf %129, %130 : vector<8x128xf32>
    %132 = arith.maximumf %124, %131 : vector<8x128xf32>
    %133 = arith.truncf %132 : vector<8x128xf32> to vector<8x128xbf16>
    %c0_37 = arith.constant 0 : index
    %c0_38 = arith.constant 0 : index
    %c0_39 = arith.constant 0 : index
    %134 = vector.load %arg6[%c0_37, %c0_38, %c0_39] : memref<2x128x128xbf16, #tpu.memory_space<vmem>>, vector<1x128x128xbf16>
    %135 = vector.shape_cast %134 : vector<1x128x128xbf16> to vector<128x128xbf16>
    %cst_40 = arith.constant dense<0.000000e+00> : vector<8x128xf32>
    %136 = tpu.matmul %133, %135, %cst_40 {dimension_numbers = #tpu.dot_dimension_numbers<[1], [0], [0], [1], [0, 0, 1, 1], [], []>} : vector<8x128xbf16>, vector<128x128xbf16>, vector<8x128xf32> -> vector<8x128xf32>
    %c0_41 = arith.constant 0 : index
    %c0_42 = arith.constant 0 : index
    %c0_43 = arith.constant 0 : index
    %137 = vector.load %arg7[%c0_41, %c0_42, %c0_43] : memref<2x1x128xf32, #tpu.memory_space<vmem>>, vector<1x1x128xf32>
    %138 = vector.shape_cast %137 : vector<1x1x128xf32> to vector<1x128xf32>
    %139 = vector.broadcast %138 : vector<1x128xf32> to vector<8x128xf32>
    %140 = arith.addf %136, %139 : vector<8x128xf32>
    %141 = arith.truncf %140 : vector<8x128xf32> to vector<8x128xbf16>
    %c0_44 = arith.constant 0 : index
    %c0_45 = arith.constant 0 : index
    %c0_46 = arith.constant 0 : index
    %142 = vector.load %arg8[%c0_44, %c0_45, %c0_46] : memref<2x128x128xbf16, #tpu.memory_space<vmem>>, vector<1x128x128xbf16>
    %143 = vector.shape_cast %142 : vector<1x128x128xbf16> to vector<128x128xbf16>
    %cst_47 = arith.constant dense<0.000000e+00> : vector<8x128xf32>
    %144 = tpu.matmul %141, %143, %cst_47 {dimension_numbers = #tpu.dot_dimension_numbers<[1], [0], [0], [1], [0, 0, 1, 1], [], []>} : vector<8x128xbf16>, vector<128x128xbf16>, vector<8x128xf32> -> vector<8x128xf32>
    %c0_48 = arith.constant 0 : index
    %c0_49 = arith.constant 0 : index
    %c0_50 = arith.constant 0 : index
    %145 = vector.load %arg9[%c0_48, %c0_49, %c0_50] : memref<2x1x128xf32, #tpu.memory_space<vmem>>, vector<1x1x128xf32>
    %146 = vector.shape_cast %145 : vector<1x1x128xf32> to vector<1x128xf32>
    %147 = vector.broadcast %146 : vector<1x128xf32> to vector<8x128xf32>
    %148 = arith.addf %144, %147 : vector<8x128xf32>
    %c0_51 = arith.constant 0 : index
    %c0_52 = arith.constant 0 : index
    %c0_53 = arith.constant 0 : index
    %149 = vector.load %arg16[%c0_51, %c0_52, %c0_53] : memref<3x8x128xf32, #tpu.memory_space<vmem>>, vector<1x8x128xf32>
    %150 = vector.shape_cast %149 : vector<1x8x128xf32> to vector<8x128xf32>
    %151 = vector.shape_cast %148 : vector<8x128xf32> to vector<1x8x128xf32>
    tpu.vector_store %arg16[%c0_51, %c0_52, %c0_53], %151 {strides = array<i32>} : memref<3x8x128xf32, #tpu.memory_space<vmem>>, vector<1x8x128xf32>,
    %c1 = arith.constant 1 : index
    %c0_54 = arith.constant 0 : index
    %c0_55 = arith.constant 0 : index
    %152 = vector.load %arg1[%c1, %c0_54, %c0_55] : memref<2x128x16xbf16, #tpu.memory_space<vmem>>, vector<1x128x16xbf16>
    %153 = vector.shape_cast %152 : vector<1x128x16xbf16> to vector<128x16xbf16>
    %c1_56 = arith.constant 1 : index
    %c0_57 = arith.constant 0 : index
    %c0_58 = arith.constant 0 : index
    %154 = vector.load %arg2[%c1_56, %c0_57, %c0_58] : memref<2x16x32xbf16, #tpu.memory_space<vmem>>, vector<1x16x32xbf16>
    %155 = vector.shape_cast %154 : vector<1x16x32xbf16> to vector<16x32xbf16>
    %cst_59 = arith.constant dense<0.000000e+00> : vector<128x32xf32>
    %156 = tpu.matmul %153, %155, %cst_59 {dimension_numbers = #tpu.dot_dimension_numbers<[1], [0], [0], [1], [0, 0, 1, 1], [], []>} : vector<128x16xbf16>, vector<16x32xbf16>, vector<128x32xf32> -> vector<128x32xf32>
    %c1_60 = arith.constant 1 : index
    %c0_61 = arith.constant 0 : index
    %c0_62 = arith.constant 0 : index
    %157 = vector.load %arg3[%c1_60, %c0_61, %c0_62] : memref<2x1x32xf32, #tpu.memory_space<vmem>>, vector<1x1x32xf32>
    %158 = vector.shape_cast %157 : vector<1x1x32xf32> to vector<1x32xf32>
    %159 = vector.broadcast %158 : vector<1x32xf32> to vector<128x32xf32>
    %160 = arith.addf %156, %159 : vector<128x32xf32>
    %cst_63 = arith.constant 0.000000e+00 : f32
    %161 = vector.broadcast %cst_63 : f32 to vector<128x32xf32>
    %162 = arith.maximumf %160, %161 : vector<128x32xf32>
    %163 = vector.extract_strided_slice %162 {offsets = [0, 0], sizes = [126, 32], strides = [1, 1]} : vector<128x32xf32> to vector<126x32xf32>
    %164 = vector.extract_strided_slice %162 {offsets = [1, 0], sizes = [126, 32], strides = [1, 1]} : vector<128x32xf32> to vector<126x32xf32>
    %165 = arith.maximumf %163, %164 : vector<126x32xf32>
    %166 = vector.extract_strided_slice %162 {offsets = [2, 0], sizes = [126, 32], strides = [1, 1]} : vector<128x32xf32> to vector<126x32xf32>
    %167 = arith.maximumf %165, %166 : vector<126x32xf32>
    %168 = vector.extract_strided_slice %167 {offsets = [0, 0], sizes = [104, 32], strides = [1, 1]} : vector<126x32xf32> to vector<104x32xf32>
    %169 = vector.extract_strided_slice %167 {offsets = [8, 0], sizes = [104, 32], strides = [1, 1]} : vector<126x32xf32> to vector<104x32xf32>
    %170 = arith.maximumf %168, %169 : vector<104x32xf32>
    %171 = vector.extract_strided_slice %167 {offsets = [16, 0], sizes = [104, 32], strides = [1, 1]} : vector<126x32xf32> to vector<104x32xf32>
    %172 = arith.maximumf %170, %171 : vector<104x32xf32>
    %173 = arith.truncf %172 : vector<104x32xf32> to vector<104x32xbf16>
    %cst_64 = arith.constant dense<0.000000e+00> : vector<72x32xf32>
    %174 = tpu.matmul %0, %173, %cst_64 {dimension_numbers = #tpu.dot_dimension_numbers<[1], [0], [0], [1], [0, 0, 1, 1], [], []>} : vector<72x104xbf16>, vector<104x32xbf16>, vector<72x32xf32> -> vector<72x32xf32>
    %175 = arith.truncf %174 : vector<72x32xf32> to vector<72x32xbf16>
    %c1_65 = arith.constant 1 : index
    %c0_66 = arith.constant 0 : index
    %c0_67 = arith.constant 0 : index
    %176 = vector.load %arg4[%c1_65, %c0_66, %c0_67] : memref<2x32x1152xbf16, #tpu.memory_space<vmem>>, vector<1x32x1152xbf16>
    %177 = vector.shape_cast %176 : vector<1x32x1152xbf16> to vector<32x1152xbf16>
    %cst_68 = arith.constant dense<0.000000e+00> : vector<72x1152xf32>
    %178 = tpu.matmul %175, %177, %cst_68 {dimension_numbers = #tpu.dot_dimension_numbers<[1], [0], [0], [1], [0, 0, 1, 1], [], []>} : vector<72x32xbf16>, vector<32x1152xbf16>, vector<72x1152xf32> -> vector<72x1152xf32>
    %c1_69 = arith.constant 1 : index
    %c0_70 = arith.constant 0 : index
    %c0_71 = arith.constant 0 : index
    %179 = vector.load %arg5[%c1_69, %c0_70, %c0_71] : memref<2x1x128xf32, #tpu.memory_space<vmem>>, vector<1x1x128xf32>
    %180 = vector.shape_cast %179 : vector<1x1x128xf32> to vector<1x128xf32>
    %cst_72 = arith.constant 0.000000e+00 : f32
    %181 = vector.broadcast %cst_72 : f32 to vector<8x128xf32>
    %182 = vector.extract_strided_slice %178 {offsets = [0, 1024], sizes = [8, 128], strides = [1, 1]} : vector<72x1152xf32> to vector<8x128xf32>
    %183 = arith.addf %181, %182 : vector<8x128xf32>
    %184 = vector.broadcast %180 : vector<1x128xf32> to vector<8x128xf32>
    %185 = arith.addf %183, %184 : vector<8x128xf32>
    %cst_73 = arith.constant 0.000000e+00 : f32
    %186 = vector.broadcast %cst_73 : f32 to vector<8x128xf32>
    %187 = arith.maximumf %185, %186 : vector<8x128xf32>
    %cst_74 = arith.constant 0.000000e+00 : f32
    %188 = vector.broadcast %cst_74 : f32 to vector<8x128xf32>
    %189 = vector.extract_strided_slice %178 {offsets = [0, 768], sizes = [8, 128], strides = [1, 1]} : vector<72x1152xf32> to vector<8x128xf32>
    %190 = arith.addf %188, %189 : vector<8x128xf32>
    %191 = vector.extract_strided_slice %178 {offsets = [8, 896], sizes = [8, 128], strides = [1, 1]} : vector<72x1152xf32> to vector<8x128xf32>
    %192 = arith.addf %190, %191 : vector<8x128xf32>
    %193 = vector.extract_strided_slice %178 {offsets = [16, 1024], sizes = [8, 128], strides = [1, 1]} : vector<72x1152xf32> to vector<8x128xf32>
    %194 = arith.addf %192, %193 : vector<8x128xf32>
    %195 = vector.broadcast %180 : vector<1x128xf32> to vector<8x128xf32>
    %196 = arith.addf %194, %195 : vector<8x128xf32>
    %cst_75 = arith.constant 0.000000e+00 : f32
    %197 = vector.broadcast %cst_75 : f32 to vector<8x128xf32>
    %198 = arith.maximumf %196, %197 : vector<8x128xf32>
    %199 = arith.maximumf %187, %198 : vector<8x128xf32>
    %cst_76 = arith.constant 0.000000e+00 : f32
    %200 = vector.broadcast %cst_76 : f32 to vector<8x128xf32>
    %201 = vector.extract_strided_slice %178 {offsets = [16, 768], sizes = [8, 128], strides = [1, 1]} : vector<72x1152xf32> to vector<8x128xf32>
    %202 = arith.addf %200, %201 : vector<8x128xf32>
    %203 = vector.broadcast %180 : vector<1x128xf32> to vector<8x128xf32>
    %204 = arith.addf %202, %203 : vector<8x128xf32>
    %cst_77 = arith.constant 0.000000e+00 : f32
    %205 = vector.broadcast %cst_77 : f32 to vector<8x128xf32>
    %206 = arith.maximumf %204, %205 : vector<8x128xf32>
    %207 = arith.maximumf %199, %206 : vector<8x128xf32>
    %cst_78 = arith.constant 0.000000e+00 : f32
    %208 = vector.broadcast %cst_78 : f32 to vector<8x128xf32>
    %209 = vector.extract_strided_slice %178 {offsets = [0, 256], sizes = [8, 128], strides = [1, 1]} : vector<72x1152xf32> to vector<8x128xf32>
    %210 = arith.addf %208, %209 : vector<8x128xf32>
    %211 = vector.extract_strided_slice %178 {offsets = [24, 640], sizes = [8, 128], strides = [1, 1]} : vector<72x1152xf32> to vector<8x128xf32>
    %212 = arith.addf %210, %211 : vector<8x128xf32>
    %213 = vector.extract_strided_slice %178 {offsets = [48, 1024], sizes = [8, 128], strides = [1, 1]} : vector<72x1152xf32> to vector<8x128xf32>
    %214 = arith.addf %212, %213 : vector<8x128xf32>
    %215 = vector.broadcast %180 : vector<1x128xf32> to vector<8x128xf32>
    %216 = arith.addf %214, %215 : vector<8x128xf32>
    %cst_79 = arith.constant 0.000000e+00 : f32
    %217 = vector.broadcast %cst_79 : f32 to vector<8x128xf32>
    %218 = arith.maximumf %216, %217 : vector<8x128xf32>
    %219 = arith.maximumf %207, %218 : vector<8x128xf32>
    %cst_80 = arith.constant 0.000000e+00 : f32
    %220 = vector.broadcast %cst_80 : f32 to vector<8x128xf32>
    %221 = vector.extract_strided_slice %178 {offsets = [0, 0], sizes = [8, 128], strides = [1, 1]} : vector<72x1152xf32> to vector<8x128xf32>
    %222 = arith.addf %220, %221 : vector<8x128xf32>
    %223 = vector.extract_strided_slice %178 {offsets = [8, 128], sizes = [8, 128], strides = [1, 1]} : vector<72x1152xf32> to vector<8x128xf32>
    %224 = arith.addf %222, %223 : vector<8x128xf32>
    %225 = vector.extract_strided_slice %178 {offsets = [16, 256], sizes = [8, 128], strides = [1, 1]} : vector<72x1152xf32> to vector<8x128xf32>
    %226 = arith.addf %224, %225 : vector<8x128xf32>
    %227 = vector.extract_strided_slice %178 {offsets = [24, 384], sizes = [8, 128], strides = [1, 1]} : vector<72x1152xf32> to vector<8x128xf32>
    %228 = arith.addf %226, %227 : vector<8x128xf32>
    %229 = vector.extract_strided_slice %178 {offsets = [32, 512], sizes = [8, 128], strides = [1, 1]} : vector<72x1152xf32> to vector<8x128xf32>
    %230 = arith.addf %228, %229 : vector<8x128xf32>
    %231 = vector.extract_strided_slice %178 {offsets = [40, 640], sizes = [8, 128], strides = [1, 1]} : vector<72x1152xf32> to vector<8x128xf32>
    %232 = arith.addf %230, %231 : vector<8x128xf32>
    %233 = vector.extract_strided_slice %178 {offsets = [48, 768], sizes = [8, 128], strides = [1, 1]} : vector<72x1152xf32> to vector<8x128xf32>
    %234 = arith.addf %232, %233 : vector<8x128xf32>
    %235 = vector.extract_strided_slice %178 {offsets = [56, 896], sizes = [8, 128], strides = [1, 1]} : vector<72x1152xf32> to vector<8x128xf32>
    %236 = arith.addf %234, %235 : vector<8x128xf32>
    %237 = vector.extract_strided_slice %178 {offsets = [64, 1024], sizes = [8, 128], strides = [1, 1]} : vector<72x1152xf32> to vector<8x128xf32>
    %238 = arith.addf %236, %237 : vector<8x128xf32>
    %239 = vector.broadcast %180 : vector<1x128xf32> to vector<8x128xf32>
    %240 = arith.addf %238, %239 : vector<8x128xf32>
    %cst_81 = arith.constant 0.000000e+00 : f32
    %241 = vector.broadcast %cst_81 : f32 to vector<8x128xf32>
    %242 = arith.maximumf %240, %241 : vector<8x128xf32>
    %243 = arith.maximumf %219, %242 : vector<8x128xf32>
    %cst_82 = arith.constant 0.000000e+00 : f32
    %244 = vector.broadcast %cst_82 : f32 to vector<8x128xf32>
    %245 = vector.extract_strided_slice %178 {offsets = [16, 0], sizes = [8, 128], strides = [1, 1]} : vector<72x1152xf32> to vector<8x128xf32>
    %246 = arith.addf %244, %245 : vector<8x128xf32>
    %247 = vector.extract_strided_slice %178 {offsets = [40, 384], sizes = [8, 128], strides = [1, 1]} : vector<72x1152xf32> to vector<8x128xf32>
    %248 = arith.addf %246, %247 : vector<8x128xf32>
    %249 = vector.extract_strided_slice %178 {offsets = [64, 768], sizes = [8, 128], strides = [1, 1]} : vector<72x1152xf32> to vector<8x128xf32>
    %250 = arith.addf %248, %249 : vector<8x128xf32>
    %251 = vector.broadcast %180 : vector<1x128xf32> to vector<8x128xf32>
    %252 = arith.addf %250, %251 : vector<8x128xf32>
    %cst_83 = arith.constant 0.000000e+00 : f32
    %253 = vector.broadcast %cst_83 : f32 to vector<8x128xf32>
    %254 = arith.maximumf %252, %253 : vector<8x128xf32>
    %255 = arith.maximumf %243, %254 : vector<8x128xf32>
    %cst_84 = arith.constant 0.000000e+00 : f32
    %256 = vector.broadcast %cst_84 : f32 to vector<8x128xf32>
    %257 = vector.extract_strided_slice %178 {offsets = [48, 256], sizes = [8, 128], strides = [1, 1]} : vector<72x1152xf32> to vector<8x128xf32>
    %258 = arith.addf %256, %257 : vector<8x128xf32>
    %259 = vector.broadcast %180 : vector<1x128xf32> to vector<8x128xf32>
    %260 = arith.addf %258, %259 : vector<8x128xf32>
    %cst_85 = arith.constant 0.000000e+00 : f32
    %261 = vector.broadcast %cst_85 : f32 to vector<8x128xf32>
    %262 = arith.maximumf %260, %261 : vector<8x128xf32>
    %263 = arith.maximumf %255, %262 : vector<8x128xf32>
    %cst_86 = arith.constant 0.000000e+00 : f32
    %264 = vector.broadcast %cst_86 : f32 to vector<8x128xf32>
    %265 = vector.extract_strided_slice %178 {offsets = [48, 0], sizes = [8, 128], strides = [1, 1]} : vector<72x1152xf32> to vector<8x128xf32>
    %266 = arith.addf %264, %265 : vector<8x128xf32>
    %267 = vector.extract_strided_slice %178 {offsets = [56, 128], sizes = [8, 128], strides = [1, 1]} : vector<72x1152xf32> to vector<8x128xf32>
    %268 = arith.addf %266, %267 : vector<8x128xf32>
    %269 = vector.extract_strided_slice %178 {offsets = [64, 256], sizes = [8, 128], strides = [1, 1]} : vector<72x1152xf32> to vector<8x128xf32>
    %270 = arith.addf %268, %269 : vector<8x128xf32>
    %271 = vector.broadcast %180 : vector<1x128xf32> to vector<8x128xf32>
    %272 = arith.addf %270, %271 : vector<8x128xf32>
    %cst_87 = arith.constant 0.000000e+00 : f32
    %273 = vector.broadcast %cst_87 : f32 to vector<8x128xf32>
    %274 = arith.maximumf %272, %273 : vector<8x128xf32>
    %275 = arith.maximumf %263, %274 : vector<8x128xf32>
    %cst_88 = arith.constant 0.000000e+00 : f32
    %276 = vector.broadcast %cst_88 : f32 to vector<8x128xf32>
    %277 = vector.extract_strided_slice %178 {offsets = [64, 0], sizes = [8, 128], strides = [1, 1]} : vector<72x1152xf32> to vector<8x128xf32>
    %278 = arith.addf %276, %277 : vector<8x128xf32>
    %279 = vector.broadcast %180 : vector<1x128xf32> to vector<8x128xf32>
    %280 = arith.addf %278, %279 : vector<8x128xf32>
    %cst_89 = arith.constant 0.000000e+00 : f32
    %281 = vector.broadcast %cst_89 : f32 to vector<8x128xf32>
    %282 = arith.maximumf %280, %281 : vector<8x128xf32>
    %283 = arith.maximumf %275, %282 : vector<8x128xf32>
    %284 = arith.truncf %283 : vector<8x128xf32> to vector<8x128xbf16>
    %c1_90 = arith.constant 1 : index
    %c0_91 = arith.constant 0 : index
    %c0_92 = arith.constant 0 : index
    %285 = vector.load %arg6[%c1_90, %c0_91, %c0_92] : memref<2x128x128xbf16, #tpu.memory_space<vmem>>, vector<1x128x128xbf16>
    %286 = vector.shape_cast %285 : vector<1x128x128xbf16> to vector<128x128xbf16>
    %cst_93 = arith.constant dense<0.000000e+00> : vector<8x128xf32>
    %287 = tpu.matmul %284, %286, %cst_93 {dimension_numbers = #tpu.dot_dimension_numbers<[1], [0], [0], [1], [0, 0, 1, 1], [], []>} : vector<8x128xbf16>, vector<128x128xbf16>, vector<8x128xf32> -> vector<8x128xf32>
    %c1_94 = arith.constant 1 : index
    %c0_95 = arith.constant 0 : index
    %c0_96 = arith.constant 0 : index
    %288 = vector.load %arg7[%c1_94, %c0_95, %c0_96] : memref<2x1x128xf32, #tpu.memory_space<vmem>>, vector<1x1x128xf32>
    %289 = vector.shape_cast %288 : vector<1x1x128xf32> to vector<1x128xf32>
    %290 = vector.broadcast %289 : vector<1x128xf32> to vector<8x128xf32>
    %291 = arith.addf %287, %290 : vector<8x128xf32>
    %292 = arith.truncf %291 : vector<8x128xf32> to vector<8x128xbf16>
    %c1_97 = arith.constant 1 : index
    %c0_98 = arith.constant 0 : index
    %c0_99 = arith.constant 0 : index
    %293 = vector.load %arg8[%c1_97, %c0_98, %c0_99] : memref<2x128x128xbf16, #tpu.memory_space<vmem>>, vector<1x128x128xbf16>
    %294 = vector.shape_cast %293 : vector<1x128x128xbf16> to vector<128x128xbf16>
    %cst_100 = arith.constant dense<0.000000e+00> : vector<8x128xf32>
    %295 = tpu.matmul %292, %294, %cst_100 {dimension_numbers = #tpu.dot_dimension_numbers<[1], [0], [0], [1], [0, 0, 1, 1], [], []>} : vector<8x128xbf16>, vector<128x128xbf16>, vector<8x128xf32> -> vector<8x128xf32>
    %c1_101 = arith.constant 1 : index
    %c0_102 = arith.constant 0 : index
    %c0_103 = arith.constant 0 : index
    %296 = vector.load %arg9[%c1_101, %c0_102, %c0_103] : memref<2x1x128xf32, #tpu.memory_space<vmem>>, vector<1x1x128xf32>
    %297 = vector.shape_cast %296 : vector<1x1x128xf32> to vector<1x128xf32>
    %298 = vector.broadcast %297 : vector<1x128xf32> to vector<8x128xf32>
    %299 = arith.addf %295, %298 : vector<8x128xf32>
    %c1_104 = arith.constant 1 : index
    %c0_105 = arith.constant 0 : index
    %c0_106 = arith.constant 0 : index
    %300 = vector.load %arg16[%c1_104, %c0_105, %c0_106] : memref<3x8x128xf32, #tpu.memory_space<vmem>>, vector<1x8x128xf32>
    %301 = vector.shape_cast %300 : vector<1x8x128xf32> to vector<8x128xf32>
    %302 = vector.shape_cast %299 : vector<8x128xf32> to vector<1x8x128xf32>
    tpu.vector_store %arg16[%c1_104, %c0_105, %c0_106], %302 {strides = array<i32>} : memref<3x8x128xf32, #tpu.memory_space<vmem>>, vector<1x8x128xf32>,
    %303 = tpu.concatenate %148, %299 in 1 : vector<8x128xf32>, vector<8x128xf32> -> vector<8x256xf32>
    %304 = arith.truncf %303 : vector<8x256xf32> to vector<8x256xbf16>
    %c0_107 = arith.constant 0 : index
    %c0_108 = arith.constant 0 : index
    %305 = vector.load %arg10[%c0_107, %c0_108] : memref<256x128xbf16, #tpu.memory_space<vmem>>, vector<256x128xbf16>
    %cst_109 = arith.constant dense<0.000000e+00> : vector<8x128xf32>
    %306 = tpu.matmul %304, %305, %cst_109 {dimension_numbers = #tpu.dot_dimension_numbers<[1], [0], [0], [1], [0, 0, 1, 1], [], []>} : vector<8x256xbf16>, vector<256x128xbf16>, vector<8x128xf32> -> vector<8x128xf32>
    %c0_110 = arith.constant 0 : index
    %c0_111 = arith.constant 0 : index
    %307 = vector.load %arg11[%c0_110, %c0_111] : memref<1x128xf32, #tpu.memory_space<vmem>>, vector<1x128xf32>
    %308 = vector.broadcast %307 : vector<1x128xf32> to vector<8x128xf32>
    %309 = arith.addf %306, %308 : vector<8x128xf32>
    %cst_112 = arith.constant 0.000000e+00 : f32
    %310 = vector.broadcast %cst_112 : f32 to vector<8x128xf32>
    %311 = arith.maximumf %309, %310 : vector<8x128xf32>
    %312 = arith.truncf %311 : vector<8x128xf32> to vector<8x128xbf16>
    %c0_113 = arith.constant 0 : index
    %c0_114 = arith.constant 0 : index
    %313 = vector.load %arg12[%c0_113, %c0_114] : memref<128x128xbf16, #tpu.memory_space<vmem>>, vector<128x128xbf16>
    %cst_115 = arith.constant dense<0.000000e+00> : vector<8x128xf32>
    %314 = tpu.matmul %312, %313, %cst_115 {dimension_numbers = #tpu.dot_dimension_numbers<[1], [0], [0], [1], [0, 0, 1, 1], [], []>} : vector<8x128xbf16>, vector<128x128xbf16>, vector<8x128xf32> -> vector<8x128xf32>
    %c0_116 = arith.constant 0 : index
    %c0_117 = arith.constant 0 : index
    %315 = vector.load %arg13[%c0_116, %c0_117] : memref<1x128xf32, #tpu.memory_space<vmem>>, vector<1x128xf32>
    %316 = vector.broadcast %315 : vector<1x128xf32> to vector<8x128xf32>
    %317 = arith.addf %314, %316 : vector<8x128xf32>
    %cst_118 = arith.constant 0.000000e+00 : f32
    %318 = vector.broadcast %cst_118 : f32 to vector<8x128xf32>
    %319 = arith.maximumf %317, %318 : vector<8x128xf32>
    %320 = arith.truncf %319 : vector<8x128xf32> to vector<8x128xbf16>
    %c0_119 = arith.constant 0 : index
    %c0_120 = arith.constant 0 : index
    %321 = vector.load %arg14[%c0_119, %c0_120] : memref<128x128xbf16, #tpu.memory_space<vmem>>, vector<128x128xbf16>
    %cst_121 = arith.constant dense<0.000000e+00> : vector<8x128xf32>
    %322 = tpu.matmul %320, %321, %cst_121 {dimension_numbers = #tpu.dot_dimension_numbers<[1], [0], [0], [1], [0, 0, 1, 1], [], []>} : vector<8x128xbf16>, vector<128x128xbf16>, vector<8x128xf32> -> vector<8x128xf32>
    %c0_122 = arith.constant 0 : index
    %c0_123 = arith.constant 0 : index
    %323 = vector.load %arg15[%c0_122, %c0_123] : memref<1x128xf32, #tpu.memory_space<vmem>>, vector<1x128xf32>
    %324 = vector.broadcast %323 : vector<1x128xf32> to vector<8x128xf32>
    %325 = arith.addf %322, %324 : vector<8x128xf32>
    %c2 = arith.constant 2 : index
    %c0_124 = arith.constant 0 : index
    %c0_125 = arith.constant 0 : index
    %326 = vector.load %arg16[%c2, %c0_124, %c0_125] : memref<3x8x128xf32, #tpu.memory_space<vmem>>, vector<1x8x128xf32>
    %327 = vector.shape_cast %326 : vector<1x8x128xf32> to vector<8x128xf32>
    %328 = vector.shape_cast %325 : vector<8x128xf32> to vector<1x8x128xf32>
    tpu.vector_store %arg16[%c2, %c0_124, %c0_125], %328 {strides = array<i32>} : memref<3x8x128xf32, #tpu.memory_space<vmem>>, vector<1x8x128xf32>,
    return
  }
}

</mosaic_0001>

<bundles_post_ra>
// kernel: _forward_pallas.1
= control target key start
LH: loop header
LB: loop body
LE: loop exit
PB: predicated region body
PF: predicated region fallthrough
CT: control target
= control target key end

     0   :  { %vm134_vm0 = vcmask 130048   ;;  %v3783_v9 = vmov 0.0   ;;  %vm3784_vm1 = vmmov 0   ;;  %vm288_vm2 = vcmask 1046528   ;;  %s4833_s2 = inlined_call_operand.vmem [shape: bf16[2,16,32], index: 2, kind: input, shape index: {}]   ;;  %s4834_s1 = inlined_call_operand.vmem [shape: bf16[2,128,16], index: 1, kind: input, shape index: {}]   ;;  %s4835_s0 = inlined_call_operand.vmem [shape: bf16[72,104], index: 0, kind: input, shape index: {}]   ;;  %s4836_s4 = inlined_call_operand.vmem [shape: bf16[2,32,1152], index: 4, kind: input, shape index: {}]   ;;  %s4837_s3 = inlined_call_operand.vmem [shape: f32[2,1,32], index: 3, kind: input, shape index: {}]   ;;  %s4838_s6 = inlined_call_operand.vmem [shape: bf16[2,128,128], index: 6, kind: input, shape index: {}]   ;;  %s4839_s8 = inlined_call_operand.vmem [shape: bf16[2,128,128], index: 8, kind: input, shape index: {}]   ;;  %s4840_s5 = inlined_call_operand.vmem [shape: f32[2,1,128], index: 5, kind: input, shape index: {}]   ;;  %s4841_s7 = inlined_call_operand.vmem [shape: f32[2,1,128], index: 7, kind: input, shape index: {}]   ;;  %s4842_s9 = inlined_call_operand.vmem [shape: f32[2,1,128], index: 9, kind: input, shape index: {}]   ;;  %s4843_s16 = inlined_call_operand.vmem [shape: f32[3,8,128], index: 16, kind: output, shape index: {}]   ;;  %s4844_s10 = inlined_call_operand.vmem [shape: bf16[256,128], index: 10, kind: input, shape index: {}]   ;;  %s4845_s12 = inlined_call_operand.vmem [shape: bf16[128,128], index: 12, kind: input, shape index: {}]   ;;  %s4846_s14 = inlined_call_operand.vmem [shape: bf16[128,128], index: 14, kind: input, shape index: {}]   ;;  %s4847_s11 = inlined_call_operand.vmem [shape: f32[1,128], index: 11, kind: input, shape index: {}]   ;;  %s4848_s13 = inlined_call_operand.vmem [shape: f32[1,128], index: 13, kind: input, shape index: {}]   ;;  %s4849_s15 = inlined_call_operand.vmem [shape: f32[1,128], index: 15, kind: input, shape index: {}]  }
   0x1   :  { %4851 = sst [smem:[#allocation2_spill]] %s4833_s2  ;;  %v3640_v1 = vld [vmem:[%s4834_s1] sm:$0xff]   ;;  %v3641_v2 = vld [vmem:[%s4834_s1 + $0x10] sm:$0xff]   ;;  %v3642_v3 = vld [vmem:[%s4834_s1 + $0x8] sm:$0xff]   ;;  %vm350_vm3 = vcmask 1045504   ;;  %vm484_vm4 = vcmask 1043456  }
   0x2   :  { %s4852_s23 = sld [smem:[#allocation2_spill]]  ;;  %3364 = vmatprep.mubr.msk.bf16.mxu0 %vm134_vm0, %v3640_v1  ;;  %3368 = vmatprep.mubr.msk.bf16.mxu1 %vm134_vm0, %v3641_v2  ;;  %v3643_v4 = vld [vmem:[%s4834_s1 + $0x18] sm:$0xff]   ;;  %v3644_v5 = vld [vmem:[%s4834_s1 + $0x20] sm:$0xff]   ;;  %v3645_v6 = vld [vmem:[%s4834_s1 + $0x28] sm:$0xff]   ;;  %vm468_vm5 = vcmask 850944   ;;  %vm677_vm6 = vcmask 261120  }
   0x3   :  { %v3646_v7 = vld [vmem:[%s4834_s1 + $0x30] sm:$0xff]   ;;  %v3647_v8 = vld [vmem:[%s4834_s1 + $0x38] sm:$0xff]   ;;  %v3653_v10 = vld [vmem:[%s4836_s4 + $0x48] ss:$36 sps:$4 sm:$0xff]  }
   0x4   :  { %v3655_v11 = vld [vmem:[%s4836_s4 + $0x4c] ss:$36 sps:$4 sm:$0xff]   ;;  %v2944_v20 = vld [vmem:[%s4837_s3] ss:$0 sm:$0xff] }
   0x8   :  { %v3639_v0 = vld [vmem:[%s4852_s23] sm:$0xff]  }
   0x9   :  { %3362 = vmatprep.subr.bf16.mxu0 %v3639_v0  ;;  %3634 = vmatprep.subr.bf16.mxu1 %v3639_v0 }
   0xa   :  { %3363 = vmatpush3.bf16.msra.mxu0 %v3639_v0  ;;  %3635 = vmatpush3.bf16.msra.mxu1 %v3639_v0 }
   0xb   :  { %3380 = vmatprep.subr.bf16.mxu1 %v3783_v9  ;;  %705 = vmatprep.subr.bf16.mxu0 %v3655_v11 }
   0xd   :  { %3365 = vmatmul.mubr.msk.bf16.vlgmr.msra.gmra.mxu0 %vm134_vm0, %v3642_v3  ;;  %3369 = vmatmul.mubr.msk.bf16.vlgmr.msra.gmra.mxu1 %vm134_vm0, %v3643_v4 }
   0xe   :  { %3372 = vmatprep.mubr.msk.bf16.mxu1 %vm134_vm0, %v3644_v5  ;;  %706 = vmatpush1.bf16.msra.mxu0 %v3653_v10 }
  0x15   :  { %3373 = vmatmul.mubr.msk.bf16.gmra.mxu1 %vm134_vm0, %v3645_v6 }
  0x16   :  { %3376 = vmatprep.mubr.msk.bf16.mxu1 %vm134_vm0, %v3646_v7 }
  0x1d   :  { %3377 = vmatmul.mubr.msk.bf16.gmra.mxu1 %vm134_vm0, %v3647_v8 }
  0x1e   :  { %3394 = vmatprep.mubr.msk.bf16.mxu1 %vm3784_vm1, %v3783_v9 }
  0xcd   :  { %v3370_v12 = vpop.f32.mrf.mxu1  ;;  %v3366_v18 = vpop.f32.mrf.mxu0 }
  0xce   :  { %v202_v21 = vadd.f32 %v3366_v18, %v2944_v20  ;;  %v218_v24 = vadd.f32 %v3370_v12, %v2944_v20 }
  0xcf   :  { %v209_v13 = vpop.f32.mrf.mxu1  ;;  %v193_v23 = vpop.f32.mrf.mxu0 }
  0xd0   :  { %v3918_v26 = vmax.f32 %v202_v21, 0.0  ;;  %v194_v28 = vadd.f32 %v2944_v20, %v193_v23  ;;  %v3920_v30 = vmax.f32 %v218_v24, 0.0  ;;  %v210_v33 = vadd.f32 %v2944_v20, %v209_v13 }
  0xd1   :  { %v3371_v14 = vpop.f32.mrf.mxu1  ;;  %v3367_v29 = vpop.f32.mrf.mxu0 }
  0xd2   :  { %v292_v32 = vrot.slane %v3918_v26, 1  ;;  %v3923_v36 = vmax.f32 %v194_v28, 0.0  ;;  %v205_v37 = vadd.f32 %v3367_v29, %v2944_v20  ;;  %v354_v41 = vrot.slane %v3918_v26, 2 }
  0xd3   :  { %v212_v15 = vpop.f32.mrf.mxu1  ;;  %v196_v38 = vpop.f32.mrf.mxu0  ;;  %v300_v42 = vrot.slane %v3920_v30, 1  ;;  %v221_v43 = vadd.f32 %v3371_v14, %v2944_v20  ;;  %v362_v50 = vrot.slane %v3920_v30, 2  ;;  %v3928_v51 = vmax.f32 %v210_v33, 0.0 }
  0xd4   :  { %v213_v45 = vadd.f32 %v2944_v20, %v212_v15  ;;  %v197_v52 = vadd.f32 %v2944_v20, %v196_v38  ;;  %v289_v54 = vrot.slane %v3923_v36, 1  ;;  %v3931_v55 = vmax.f32 %v205_v37, 0.0 }
  0xd5   :  { %v3374_v16 = vpop.f32.mrf.mxu1  ;;  %v351_v58 = vrot.slane %v3923_v36, 2  ;;  %v3938_v59 = vmax.f32 %v221_v43, 0.0  ;;  %v296_v2 = vrot.slane %v3928_v51, 1  ;;  %v358_v3 = vrot.slane %v3928_v51, 2 }
  0xd6   :  { %v234_v46 = vadd.f32 %v3374_v16, %v2944_v20  ;;  %v3940_v62 = vmax.f32 %v213_v45, 0.0  ;;  %v3946_v4 = vmax.f32 %v197_v52, 0.0  ;;  %v294_v6 = vrot.slane %v3931_v55, 1 }
  0xd7   :  { %v225_v17 = vpop.f32.mrf.mxu1  ;;  %v356_v7 = vrot.slane %v3931_v55, 2  ;;  %v302_v11 = vrot.slane %v3938_v59, 1  ;;  %v364_v12 = vrot.slane %v3938_v59, 2 }
  0xd8   :  { %v226_v47 = vadd.f32 %v2944_v20, %v225_v17  ;;  %v266_v63 = vmax.f32 %v234_v46, 0.0  ;;  %v298_v15 = vrot.slane %v3940_v62, 1 }
  0xd9   :  { %v3375_v19 = vpop.f32.mrf.mxu1 }
  0xda   :  { %v237_v39 = vadd.f32 %v3375_v19, %v2944_v20  ;;  %v3942_v0 = vmax.f32 %v226_v47, 0.0  ;;  %v308_v16 = vrot.slane %v266_v63, 1 }
  0xdb   :  { %v228_v22 = vpop.f32.mrf.mxu1 }
  0xdc   :  { %v229_v40 = vadd.f32 %v2944_v20, %v228_v22  ;;  %v3933_v56 = vmax.f32 %v237_v39, 0.0  ;;  %v304_v17 = vrot.slane %v3942_v0, 1  ;;  %v370_v39 = vrot.slane %v266_v63, 2 }
  0xdd   :  { %v3378_v25 = vpop.f32.mrf.mxu1 }
  0xde   :  { %v250_v44 = vadd.f32 %v3378_v25, %v2944_v20  ;;  %v3935_v57 = vmax.f32 %v229_v40, 0.0  ;;  %v310_v8 = vrot.slane %v3933_v56, 1  ;;  %v372_v19 = vrot.slane %v3933_v56, 2 }
  0xdf   :  { %v241_v27 = vpop.f32.mrf.mxu1 }
  0xe0   :  { %v242_v34 = vadd.f32 %v2944_v20, %v241_v27  ;;  %v270_v60 = vmax.f32 %v250_v44, 0.0  ;;  %v306_v10 = vrot.slane %v3935_v57, 1  ;;  %v311_v23 = vsel %vm288_vm2, %v308_v16, %v310_v8 }
  0xe1   :  { %v3379_v31 = vpop.f32.mrf.mxu1  ;;  %v368_v40 = vrot.slane %v3935_v57, 2  ;;  %v345_v45 = vmax.f32 %v266_v63, %v311_v23  ;;  %v303_v63 = vsel %vm288_vm2, %v300_v42, %v302_v11 }
  0xe2   :  { %v253_v35 = vadd.f32 %v3379_v31, %v2944_v20  ;;  %v268_v48 = vmax.f32 %v242_v34, 0.0  ;;  %v316_v13 = vrot.slane %v270_v60, 1  ;;  %v307_v24 = vsel %vm288_vm2, %v304_v17, %v306_v10 }
  0xe3   :  { %v244_v49 = vpop.f32.mrf.mxu1  ;;  %v378_v25 = vrot.slane %v270_v60, 2  ;;  %v309_v34 = vsel %vm288_vm2, %v306_v10, %v308_v16  ;;  %v343_v52 = vmax.f32 %v3942_v0, %v307_v24  ;;  %v341_v23 = vmax.f32 %v3920_v30, %v303_v63 }
  0xe4   :  { %v271_v53 = vmax.f32 %v253_v35, 0.0  ;;  %v245_v61 = vadd.f32 %v2944_v20, %v244_v49  ;;  %v312_v1 = vrot.slane %v268_v48, 1  ;;  %v374_v27 = vrot.slane %v268_v48, 2 }
  0xe6   :  { %v318_v5 = vrot.slane %v271_v53, 1  ;;  %v269_v14 = vmax.f32 %v245_v61, 0.0  ;;  %v313_v18 = vsel %vm288_vm2, %v310_v8, %v312_v1  ;;  %v380_v29 = vrot.slane %v271_v53, 2 }
  0xe7   :  { %v346_v28 = vmax.f32 %v3933_v56, %v313_v18  ;;  %v375_v46 = vsel %vm350_vm3, %v372_v19, %v374_v27  ;;  %v344_v53 = vmax.f32 %v3935_v57, %v309_v34  ;;  %v366_v61 = vrot.slane %v3942_v0, 2 }
  0xe8   :  { %v319_v20 = vsel %vm288_vm2, %v316_v13, %v318_v5  ;;  %v314_v21 = vrot.slane %v269_v14, 1  ;;  %v376_v22 = vrot.slane %v269_v14, 2  ;;  %v299_v8 = vsel %vm288_vm2, %v296_v2, %v298_v15 }
  0xe9   :  { %v349_v35 = vmax.f32 %v270_v60, %v319_v20  ;;  %v408_v56 = vmax.f32 %v346_v28, %v375_v46  ;;  %v305_v60 = vsel %vm288_vm2, %v302_v11, %v304_v17  ;;  %v301_v57 = vsel %vm288_vm2, %v298_v15, %v300_v42 }
  0xea   :  { %v315_v31 = vsel %vm288_vm2, %v312_v1, %v314_v21  ;;  %v317_v33 = vsel %vm288_vm2, %v314_v21, %v316_v13  ;;  %v377_v43 = vsel %vm350_vm3, %v374_v27, %v376_v22  ;;  %v379_v44 = vsel %vm350_vm3, %v376_v22, %v378_v25 }
  0xeb   :  { %v347_v37 = vmax.f32 %v268_v48, %v315_v31  ;;  %v348_v38 = vmax.f32 %v269_v14, %v317_v33  ;;  %v381_v48 = vsel %vm350_vm3, %v378_v25, %v380_v29  ;;  %v373_v13 = vsel %vm350_vm3, %v370_v39, %v372_v19 }
  0xec   :  { %v411_v1 = vmax.f32 %v349_v35, %v381_v48  ;;  %v369_v14 = vsel %vm350_vm3, %v366_v61, %v368_v40  ;;  %v371_v0 = vsel %vm350_vm3, %v368_v40, %v370_v39  ;;  %v342_v17 = vmax.f32 %v3938_v59, %v305_v60 }
  0xed   :  { %v409_v47 = vmax.f32 %v347_v37, %v377_v43  ;;  %v410_v49 = vmax.f32 %v348_v38, %v379_v44  ;;  %v407_v18 = vmax.f32 %v345_v45, %v373_v13  ;;  %v405_v11 = vmax.f32 %v343_v52, %v369_v14 }
  0xee   :  { %v406_v20 = vmax.f32 %v344_v53, %v371_v0  ;;  %v295_v21 = vsel %vm288_vm2, %v292_v32, %v294_v6  ;;  %v290_v22 = vrot.slane %v3946_v4, 1  ;;  %v360_v42 = vrot.slane %v3940_v62, 2 }
  0xef   :  { %v424_v5 = vmax.f32 %v409_v47, %v410_v49  ;;  %v423_v10 = vmax.f32 %v408_v56, %v409_v47  ;;  %v297_v19 = vsel %vm288_vm2, %v294_v6, %v296_v2  ;;  %v422_v24 = vmax.f32 %v407_v18, %v408_v56 }
  0xf0   :  { %v339_v27 = vmax.f32 %v3928_v51, %v299_v8  ;;  %v340_v28 = vmax.f32 %v3940_v62, %v301_v57  ;;  %v367_v29 = vsel %vm350_vm3, %v364_v12, %v366_v61  ;;  %v420_v35 = vmax.f32 %v405_v11, %v406_v20 }
  0xf1   :  { %v437_v16 = vmax.f32 %v424_v5, %v411_v1  ;;  %v436_v25 = vmax.f32 %v423_v10, %v410_v49  ;;  %v404_v33 = vmax.f32 %v342_v17, %v367_v29  ;;  %v435_v34 = vmax.f32 %v422_v24, %v409_v47  ;;  %v3661_v24 = vld [vmem:[%s4836_s4 + $0x4] ss:$36 sps:$4 sm:$0xff]  }
  0xf2   :  { %v421_v37 = vmax.f32 %v406_v20, %v407_v18  ;;  %v337_v2 = vmax.f32 %v3918_v26, %v295_v21  ;;  %v338_v6 = vmax.f32 %v3931_v55, %v297_v19  ;;  %v357_v62 = vsel %vm350_vm3, %v354_v41, %v356_v7  ;;  %v3656_v21 = vld [vmem:[%s4836_s4 + $0x50] ss:$36 sps:$4 sm:$0xff]   ;;  %v3652_v19 = vld [vmem:[%s4835_s0 + $0x20] ss:$0 sps:$4 sm:$0xff]   ;;  %707 = vmatprep.subr.bf16.mxu0 %v3661_v24 }
  0xf3   :  { %v444_v15 = vpack.c.bf16 %v437_v16, %v437_v16  ;;  %v352_v38 = vrot.slane %v3946_v4, 2  ;;  %v291_v39 = vsel %vm288_vm2, %v289_v54, %v290_v22  ;;  %v443_v40 = vpack.c.bf16 %v436_v25, %v435_v34  ;;  %v3662_v25 = vld [vmem:[%s4836_s4 + $0x8] ss:$36 sps:$4 sm:$0xff]  }
  0xf4   :  { %v434_v43 = vmax.f32 %v421_v37, %v408_v56  ;;  %v419_v44 = vmax.f32 %v404_v33, %v405_v11  ;;  %v365_v45 = vsel %vm350_vm3, %v362_v50, %v364_v12  ;;  %v293_v46 = vsel %vm288_vm2, %v290_v22, %v292_v32  ;;  %v3649_v22 = vld [vmem:[%s4835_s0 + $0x8] sm:$0xff]   ;;  %v3665_v37 = vld [vmem:[%s4836_s4 + $0x58] ss:$36 sps:$4 sm:$0xff]  }
  0xf5   :  { %v486_v31 = vsel %vm484_vm4, %v444_v15, 0  ;;  %v361_v47 = vsel %vm350_vm3, %v358_v3, %v360_v42  ;;  %v363_v54 = vsel %vm350_vm3, %v360_v42, %v362_v50  ;;  %v403_v49 = vmax.f32 %v341_v23, %v365_v45  ;;  %v3650_v42 = vld [vmem:[%s4835_s0 + $0x10] sm:$0xff]   ;;  %v3651_v15 = vld [vmem:[%s4835_s0 + $0x18] sm:$0xff]   ;;  %v3659_v23 = vld [vmem:[%s4836_s4] ss:$36 sps:$4 sm:$0xff]  }
  0xf6   :  { %3381 = vmatpush3.bf16.msra.mxu1 %v486_v31  ;;  %v401_v52 = vmax.f32 %v339_v27, %v361_v47  ;;  %v402_v53 = vmax.f32 %v340_v28, %v363_v54  ;;  %v433_v59 = vmax.f32 %v420_v35, %v407_v18  ;;  %v335_v56 = vmax.f32 %v3923_v36, %v291_v39  ;;  %v3658_v18 = vld [vmem:[%s4836_s4 + $0x54] ss:$36 sps:$4 sm:$0xff]   ;;  %v3664_v27 = vld [vmem:[%s4836_s4 + $0xc] ss:$36 sps:$4 sm:$0xff]   ;;  %v3667_v28 = vld [vmem:[%s4836_s4 + $0x5c] ss:$36 sps:$4 sm:$0xff]  }
  0xf7   :  { %3382 = vmatprep.subr.bf16.mxu1 %v3783_v9  ;;  %v353_v12 = vsel %vm350_vm3, %v351_v58, %v352_v38  ;;  %v336_v32 = vmax.f32 %v3946_v4, %v293_v46  ;;  %v418_v60 = vmax.f32 %v403_v49, %v404_v33  ;;  %v432_v30 = vmax.f32 %v419_v44, %v406_v20  ;;  %v3648_v20 = vld [vmem:[%s4835_s0] sm:$0xff]   ;;  %v3674_v45 = vld [vmem:[%s4836_s4 + $0x18] ss:$36 sps:$4 sm:$0xff]  }
  0xf8   :  { %v442_v48 = vpack.c.bf16 %v434_v43, %v433_v59  ;;  %v359_v50 = vsel %vm350_vm3, %v356_v7, %v358_v3  ;;  %v399_v61 = vmax.f32 %v337_v2, %v357_v62  ;;  %v355_v36 = vsel %vm350_vm3, %v352_v38, %v354_v41  ;;  %708 = vmatpush1.bf16.msra.mxu0 %v3659_v23  ;;  %v3673_v31 = vld [vmem:[%s4836_s4 + $0x64] ss:$36 sps:$4 sm:$0xff]   ;;  %v3676_v39 = vld [vmem:[%s4836_s4 + $0x1c] ss:$36 sps:$4 sm:$0xff]   ;;  %v3668_v43 = vld [vmem:[%s4836_s4 + $0x10] ss:$36 sps:$4 sm:$0xff]  }
  0xf9   :  { %v400_v1 = vmax.f32 %v338_v6, %v359_v50  ;;  %v431_v58 = vmax.f32 %v418_v60, %v405_v11  ;;  %v416_v5 = vmax.f32 %v401_v52, %v402_v53  ;;  %v417_v63 = vmax.f32 %v402_v53, %v403_v49  ;;  %843 = vmatprep.subr.bf16.mxu0 %v3667_v28  ;;  %v3670_v6 = vld [vmem:[%s4836_s4 + $0x14] ss:$36 sps:$4 sm:$0xff]   ;;  %v3671_v38 = vld [vmem:[%s4836_s4 + $0x60] ss:$36 sps:$4 sm:$0xff]  }
  0xfa   :  { %3383 = vmatpush3.bf16.msra.mxu1 %v443_v40  ;;  %v397_v4 = vmax.f32 %v335_v56, %v353_v12  ;;  %v398_v8 = vmax.f32 %v336_v32, %v355_v36  ;;  %v3785_v29 = vmov 0  }
  0xfb   :  { %3384 = vmatprep.subr.bf16.mxu1 %v3783_v9  ;;  %v441_v57 = vpack.c.bf16 %v432_v30, %v431_v58  ;;  %v430_v51 = vmax.f32 %v417_v63, %v404_v33  ;;  %v415_v10 = vmax.f32 %v400_v1, %v401_v52  ;;  %v429_v55 = vmax.f32 %v416_v5, %v403_v49  ;;  %v3677_v5 = vld [vmem:[%s4836_s4 + $0x68] ss:$36 sps:$4 sm:$0xff]   ;;  %v3678_v63 = vld [vmem:[%s4836_s4 + $0x20] ss:$36 sps:$4 sm:$0xff]  }
  0xfc   :  { %v414_v3 = vmax.f32 %v399_v61, %v400_v1  ;;  %v412_v26 = vmax.f32 %v397_v4, %v398_v8  ;;  %v413_v7 = vmax.f32 %v398_v8, %v399_v61  ;;  %725 = vmatprep.mubr.bf16.mxu0 %v3785_v29  ;;  %v3679_v4 = vld [vmem:[%s4838_s6 + $0x38] sm:$0xff]   ;;  %v3680_v8 = vld [vmem:[%s4838_s6 + $0x30] sm:$0xff]  }
  0xfd   :  { %v440_v41 = vpack.c.bf16 %v430_v51, %v429_v55  ;;  %v428_v13 = vmax.f32 %v415_v10, %v402_v53  ;;  %v3682_v51 = vld [vmem:[%s4838_s6 + $0x20] sm:$0xff]   ;;  %v3683_v10 = vld [vmem:[%s4838_s6 + $0x18] sm:$0xff]   ;;  %v3684_v55 = vld [vmem:[%s4838_s6 + $0x10] sm:$0xff]  }
  0xfe   :  { %3385 = vmatpush3.bf16.msra.mxu1 %v442_v48  ;;  %v427_v14 = vmax.f32 %v414_v3, %v401_v52  ;;  %v425_v16 = vmax.f32 %v412_v26, %v399_v61  ;;  %v426_v17 = vmax.f32 %v413_v7, %v400_v1  ;;  %v3685_v3 = vld [vmem:[%s4838_s6 + $0x8] sm:$0xff]  }
  0xff   :  { %3386 = vmatprep.subr.bf16.mxu1 %v3783_v9 }
 0x100   :  { %v439_v0 = vpack.c.bf16 %v428_v13, %v427_v14  ;;  %v438_v11 = vpack.c.bf16 %v426_v17, %v425_v16  ;;  %v3686_v14 = vld [vmem:[%s4838_s6] sm:$0xff]   ;;  %v4235_v17 = vld [vmem:[%s4852_s23 + $0x8] sm:$0xff]  }
 0x102   :  { %3387 = vmatpush3.bf16.msra.mxu1 %v441_v57  ;;  %v3681_v57 = vld [vmem:[%s4838_s6 + $0x28] sm:$0xff]  }
 0x103   :  { %3388 = vmatprep.subr.bf16.mxu1 %v3783_v9 }
 0x106   :  { %3389 = vmatpush3.bf16.msra.mxu1 %v440_v41 }
 0x107   :  { %3390 = vmatprep.subr.bf16.mxu1 %v3783_v9 }
 0x10a   :  { %3391 = vmatpush3.bf16.msra.mxu1 %v439_v0 }
 0x10b   :  { %3392 = vmatprep.subr.bf16.mxu1 %v3783_v9 }
 0x10e   :  { %3393 = vmatpush3.bf16.msra.mxu1 %v438_v11 }
 0x10f   :  { %774 = vmatprep.subr.bf16.mxu1 %v3658_v18 }
 0x111   :  { %3395 = vmatmul.mubr.msk.bf16.vlgmr.msra.gmra.mxu1 %vm468_vm5, %v3648_v20 }
 0x112   :  { %3398 = vmatprep.mubr.msk.bf16.mxu1 %vm3784_vm1, %v3783_v9  ;;  %775 = vmatpush1.bf16.msra.mxu1 %v3656_v21 }
 0x113   :  { %776 = vmatprep.subr.bf16.mxu1 %v3664_v27 }
 0x116   :  { %777 = vmatpush1.bf16.msra.mxu1 %v3662_v25 }
 0x117   :  { %909 = vmatprep.subr.bf16.mxu1 %v3673_v31 }
 0x119   :  { %3399 = vmatmul.mubr.msk.bf16.gmra.mxu1 %vm468_vm5, %v3649_v22 }
 0x11a   :  { %3402 = vmatprep.mubr.msk.bf16.mxu1 %vm3784_vm1, %v3783_v9 }
 0x121   :  { %3403 = vmatmul.mubr.msk.bf16.gmra.mxu1 %vm468_vm5, %v3650_v42 }
 0x122   :  { %3406 = vmatprep.mubr.msk.bf16.mxu1 %vm3784_vm1, %v3783_v9 }
 0x129   :  { %3407 = vmatmul.mubr.msk.bf16.gmra.mxu1 %vm468_vm5, %v3651_v15 }
 0x12a   :  { %3410 = vmatprep.mubr.msk.bf16.mxu1 %vm3784_vm1, %v3783_v9 }
 0x131   :  { %3411 = vmatmul.mubr.msk.bf16.gmra.mxu1 %vm468_vm5, %v3652_v19 }
 0x132   :  { %794 = vmatprep.mubr.bf16.mxu1 %v3785_v29 }
 0x1d1   :  { %v522_v33 = vpop.f32.mrf.mxu1 }
 0x1d3   :  { %v3396_v34 = vpop.f32.mrf.mxu1 }
 0x1d5   :  { %v525_v35 = vpop.f32.mrf.mxu1 }
 0x1d6   :  { %v4103_v2 = vpack.c.bf16 %v525_v35, %v522_v33 }
 0x1d7   :  { %v3397_v62 = vpop.f32.mrf.mxu1 }
 0x1d8   :  { %2990 = vmatmul.mubr.msk.bf16.vlgmr.msra.gmra.mxu0 %vm677_vm6, %v4103_v2  ;;  %2995 = vmatmul.mubr.msk.bf16.vlgmr.msra.gmra.mxu1 %vm677_vm6, %v4103_v2 }
 0x1d9   :  { %844 = vmatpush1.bf16.msra.mxu0 %v3665_v37  ;;  %v530_v40 = vpop.f32.mrf.mxu1  ;;  %733 = vmatprep.mubr.bf16.mxu0 %v3785_v29 }
 0x1da   :  { %801 = vmatprep.mubr.bf16.mxu1 %v3785_v29  ;;  %845 = vmatprep.subr.bf16.mxu0 %v3670_v6 }
 0x1db   :  { %v3400_v44 = vpop.f32.mrf.mxu1  ;;  %910 = vmatpush1.bf16.msra.mxu1 %v3671_v38 }
 0x1dc   :  { %911 = vmatprep.subr.bf16.mxu1 %v3676_v39 }
 0x1dd   :  { %v533_v46 = vpop.f32.mrf.mxu1  ;;  %846 = vmatpush1.bf16.msra.mxu0 %v3668_v43 }
 0x1de   :  { %v4126_v47 = vpack.c.bf16 %v533_v46, %v530_v40  ;;  %3414 = vmatprep.subr.bf16.mxu0 %v3783_v9 }
 0x1df   :  { %v3401_v54 = vpop.f32.mrf.mxu1  ;;  %912 = vmatpush1.bf16.msra.mxu1 %v3674_v45 }
 0x1e0   :  { %2991 = vmatmul.mubr.msk.bf16.gmra.mxu0 %vm677_vm6, %v4126_v47  ;;  %2996 = vmatmul.mubr.msk.bf16.gmra.mxu1 %vm677_vm6, %v4126_v47 }
 0x1e1   :  { %v538_v49 = vpop.f32.mrf.mxu1  ;;  %740 = vmatprep.mubr.bf16.mxu0 %v3785_v29  ;;  %809 = vmatprep.mubr.bf16.mxu1 %v3785_v29 }
 0x1e2   :  { %3438 = vmatprep.subr.bf16.mxu1 %v3783_v9 }
 0x1e3   :  { %v3404_v52 = vpop.f32.mrf.mxu1 }
 0x1e5   :  { %v541_v53 = vpop.f32.mrf.mxu1 }
 0x1e6   :  { %v562_v59 = vpack.c.bf16 %v541_v53, %v538_v49 }
 0x1e7   :  { %v3405_v56 = vpop.f32.mrf.mxu1 }
 0x1e8   :  { %2992 = vmatmul.mubr.msk.bf16.gmra.mxu0 %vm677_vm6, %v562_v59  ;;  %2997 = vmatmul.mubr.msk.bf16.gmra.mxu1 %vm677_vm6, %v562_v59 }
 0x1e9   :  { %v546_v12 = vpop.f32.mrf.mxu1  ;;  %746 = vmatprep.mubr.bf16.mxu0 %v3785_v29  ;;  %816 = vmatprep.mubr.bf16.mxu1 %v3785_v29 }
 0x1eb   :  { %v3408_v32 = vpop.f32.mrf.mxu1 }
 0x1ec   :  { %v3696_v32 = vld [vmem:[%s4839_s8 + $0x38] sm:$0xff]  }
 0x1ed   :  { %v549_v48 = vpop.f32.mrf.mxu1 }
 0x1ee   :  { %v563_v60 = vpack.c.bf16 %v549_v48, %v546_v12 }
 0x1ef   :  { %v3409_v30 = vpop.f32.mrf.mxu1 }
 0x1f0   :  { %2993 = vmatmul.mubr.msk.bf16.gmra.mxu0 %vm677_vm6, %v563_v60  ;;  %2998 = vmatmul.mubr.msk.bf16.gmra.mxu1 %vm677_vm6, %v563_v60  ;;  %v3697_v30 = vld [vmem:[%s4839_s8 + $0x30] sm:$0xff]  }
 0x1f1   :  { %v554_v50 = vpop.f32.mrf.mxu1  ;;  %754 = vmatprep.mubr.bf16.mxu0 %v3785_v29  ;;  %823 = vmatprep.mubr.bf16.mxu1 %v3785_v29 }
 0x1f2   :  { %v564_v36 = vpack.c.bf16 %v554_v50, %v554_v50 }
 0x1f3   :  { %v3412_v61 = vpop.f32.mrf.mxu1 }
 0x1f5   :  { %v557_v1 = vpop.f32.mrf.mxu1 }
 0x1f7   :  { %v3413_v58 = vpop.f32.mrf.mxu1 }
 0x1f8   :  { %2994 = vmatmul.mubr.msk.bf16.gmra.mxu0 %vm677_vm6, %v564_v36  ;;  %2999 = vmatmul.mubr.msk.bf16.gmra.mxu1 %vm677_vm6, %v564_v36  ;;  %v3698_v58 = vld [vmem:[%s4839_s8 + $0x28] sm:$0xff]  }
 0x1f9   :  { %863 = vmatprep.mubr.bf16.mxu0 %v3785_v29  ;;  %929 = vmatprep.mubr.bf16.mxu1 %v3785_v29 }
 0x200   :  { %3000 = vmatmul.mubr.msk.bf16.vlgmr.msra.gmra.mxu0 %vm677_vm6, %v4103_v2  ;;  %3005 = vmatmul.mubr.msk.bf16.vlgmr.msra.gmra.mxu1 %vm677_vm6, %v4103_v2 }
 0x201   :  { %3415 = vmatpush3.bf16.msra.mxu0 %v3677_v5  ;;  %869 = vmatprep.mubr.bf16.mxu0 %v3785_v29 }
 0x202   :  { %937 = vmatprep.mubr.bf16.mxu1 %v3785_v29  ;;  %3416 = vmatprep.subr.bf16.mxu0 %v3783_v9 }
 0x203   :  { %3439 = vmatpush3.bf16.msra.mxu1 %v3679_v4  ;;  %v3699_v4 = vld [vmem:[%s4839_s8 + $0x20] sm:$0xff]  }
 0x204   :  { %3440 = vmatprep.subr.bf16.mxu1 %v3783_v9 }
 0x205   :  { %3417 = vmatpush3.bf16.msra.mxu0 %v3678_v63 }
 0x206   :  { %3458 = vmatprep.subr.bf16.mxu0 %v3783_v9 }
 0x207   :  { %3441 = vmatpush3.bf16.msra.mxu1 %v3680_v8 }
 0x208   :  { %3001 = vmatmul.mubr.msk.bf16.gmra.mxu0 %vm677_vm6, %v4126_v47  ;;  %3006 = vmatmul.mubr.msk.bf16.gmra.mxu1 %vm677_vm6, %v4126_v47 }
 0x209   :  { %876 = vmatprep.mubr.bf16.mxu0 %v3785_v29  ;;  %944 = vmatprep.mubr.bf16.mxu1 %v3785_v29 }
 0x20a   :  { %3442 = vmatprep.subr.bf16.mxu1 %v3783_v9 }
 0x20b   :  { %3443 = vmatpush3.bf16.msra.mxu1 %v3681_v57 }
 0x20c   :  { %3444 = vmatprep.subr.bf16.mxu1 %v3783_v9 }
 0x20f   :  { %3445 = vmatpush3.bf16.msra.mxu1 %v3682_v51 }
 0x210   :  { %3002 = vmatmul.mubr.msk.bf16.gmra.mxu0 %vm677_vm6, %v562_v59  ;;  %3007 = vmatmul.mubr.msk.bf16.gmra.mxu1 %vm677_vm6, %v562_v59 }
 0x211   :  { %884 = vmatprep.mubr.bf16.mxu0 %v3785_v29  ;;  %950 = vmatprep.mubr.bf16.mxu1 %v3785_v29 }
 0x212   :  { %3446 = vmatprep.subr.bf16.mxu1 %v3783_v9 }
 0x213   :  { %3447 = vmatpush3.bf16.msra.mxu1 %v3683_v10 }
 0x214   :  { %3448 = vmatprep.subr.bf16.mxu1 %v3783_v9 }
 0x217   :  { %3449 = vmatpush3.bf16.msra.mxu1 %v3684_v55 }
 0x218   :  { %3003 = vmatmul.mubr.msk.bf16.gmra.mxu0 %vm677_vm6, %v563_v60  ;;  %3008 = vmatmul.mubr.msk.bf16.gmra.mxu1 %vm677_vm6, %v563_v60 }
 0x219   :  { %890 = vmatprep.mubr.bf16.mxu0 %v3785_v29  ;;  %958 = vmatprep.mubr.bf16.mxu1 %v3785_v29 }
 0x21a   :  { %3450 = vmatprep.subr.bf16.mxu1 %v3783_v9 }
 0x21b   :  { %3451 = vmatpush3.bf16.msra.mxu1 %v3685_v3 }
 0x21c   :  { %3452 = vmatprep.subr.bf16.mxu1 %v3783_v9 }
 0x21f   :  { %3453 = vmatpush3.bf16.msra.mxu1 %v3686_v14 }
 0x220   :  { %3004 = vmatmul.mubr.msk.bf16.gmra.mxu0 %vm677_vm6, %v564_v36  ;;  %3009 = vmatmul.mubr.msk.bf16.gmra.mxu1 %vm677_vm6, %v564_v36 }
 0x221   :  { %3418 = vmatprep.mubr.msk.bf16.mxu0 %vm3784_vm1, %v3783_v9  ;;  %3454 = vmatprep.mubr.msk.bf16.mxu1 %vm3784_vm1, %v3783_v9 }
 0x222   :  { %3478 = vmatprep.subr.bf16.mxu1 %v4235_v17 }
 0x228   :  { %3419 = vmatmul.mubr.msk.bf16.vlgmr.msra.gmra.mxu0 %vm677_vm6, %v4103_v2 }
 0x229   :  { %3422 = vmatprep.mubr.msk.bf16.mxu0 %vm3784_vm1, %v3783_v9  ;;  %3459 = vmatpush3.bf16.msra.mxu0 %v3696_v32 }
 0x22a   :  { %3460 = vmatprep.subr.bf16.mxu0 %v3783_v9 }
 0x22d   :  { %3461 = vmatpush3.bf16.msra.mxu0 %v3697_v30 }
 0x22e   :  { %3462 = vmatprep.subr.bf16.mxu0 %v3783_v9 }
 0x230   :  { %3423 = vmatmul.mubr.msk.bf16.gmra.mxu0 %vm677_vm6, %v4126_v47 }
 0x231   :  { %3426 = vmatprep.mubr.msk.bf16.mxu0 %vm3784_vm1, %v3783_v9  ;;  %3463 = vmatpush3.bf16.msra.mxu0 %v3698_v58 }
 0x232   :  { %3464 = vmatprep.subr.bf16.mxu0 %v3783_v9 }
 0x235   :  { %3465 = vmatpush3.bf16.msra.mxu0 %v3699_v4 }
 0x236   :  { %3466 = vmatprep.subr.bf16.mxu0 %v3783_v9 }
 0x238   :  { %3427 = vmatmul.mubr.msk.bf16.gmra.mxu0 %vm677_vm6, %v562_v59 }
 0x239   :  { %3430 = vmatprep.mubr.msk.bf16.mxu0 %vm3784_vm1, %v3783_v9 }
 0x240   :  { %3431 = vmatmul.mubr.msk.bf16.gmra.mxu0 %vm677_vm6, %v563_v60 }
 0x241   :  { %3434 = vmatprep.mubr.msk.bf16.mxu0 %vm3784_vm1, %v3783_v9 }
 0x248   :  { %3435 = vmatmul.mubr.msk.bf16.gmra.mxu0 %vm677_vm6, %v564_v36 }
 0x249   :  { %3474 = vmatprep.mubr.msk.bf16.mxu0 %vm3784_vm1, %v3783_v9 }
 0x298   :  { %v727_v26 = vpop.f32.mrf.mxu0  ;;  %v4225_v7 = vpop.f32.mrf.mxu1 }
 0x29a   :  { %v729_v41 = vpop.f32.mrf.mxu0  ;;  %v798_v13 = vpop.f32.mrf.mxu1 }
 0x29c   :  { %v730_v0 = vpop.f32.mrf.mxu0  ;;  %v799_v16 = vpop.f32.mrf.mxu1 }
 0x29d   :  { %v3701_v16 = vld [vmem:[%s4839_s8 + $0x10] sm:$0xff]  }
 0x29e   :  { %v731_v18 = vpop.f32.mrf.mxu0  ;;  %v800_v11 = vpop.f32.mrf.mxu1 }
 0x29f   :  { %v1060_v20 = vadd.f32 %v731_v18, %v727_v26  ;;  %v3700_v26 = vld [vmem:[%s4839_s8 + $0x18] sm:$0xff]  }
 0x2a0   :  { %v4237_v21 = vpop.f32.mrf.mxu0  ;;  %v803_v22 = vpop.f32.mrf.mxu1  ;;  %3467 = vmatpush3.bf16.msra.mxu0 %v3700_v26 }
 0x2a1   :  { %v4240_v42 = vadd.f32 %v1060_v20, %v803_v22  ;;  %3468 = vmatprep.subr.bf16.mxu0 %v3783_v9 }
 0x2a2   :  { %v737_v15 = vpop.f32.mrf.mxu0  ;;  %v805_v19 = vpop.f32.mrf.mxu1 }
 0x2a3   :  { %v3702_v15 = vld [vmem:[%s4839_s8 + $0x8] sm:$0xff]  }
 0x2a4   :  { %v738_v23 = vpop.f32.mrf.mxu0  ;;  %v806_v24 = vpop.f32.mrf.mxu1  ;;  %3469 = vmatpush3.bf16.msra.mxu0 %v3701_v16 }
 0x2a5   :  { %3470 = vmatprep.subr.bf16.mxu0 %v3783_v9 }
 0x2a6   :  { %v739_v25 = vpop.f32.mrf.mxu0  ;;  %v4242_v27 = vpop.f32.mrf.mxu1 }
 0x2a8   :  { %v742_v28 = vpop.f32.mrf.mxu0  ;;  %v811_v31 = vpop.f32.mrf.mxu1  ;;  %3471 = vmatpush3.bf16.msra.mxu0 %v3702_v15 }
 0x2a9   :  { %3472 = vmatprep.subr.bf16.mxu0 %v3783_v9 }
 0x2aa   :  { %v743_v33 = vpop.f32.mrf.mxu0  ;;  %v812_v34 = vpop.f32.mrf.mxu1 }
 0x2ac   :  { %v744_v35 = vpop.f32.mrf.mxu0  ;;  %v813_v37 = vpop.f32.mrf.mxu1 }
 0x2ae   :  { %v745_v2 = vpop.f32.mrf.mxu0  ;;  %v4244_v6 = vpop.f32.mrf.mxu1 }
 0x2b0   :  { %v748_v62 = vpop.f32.mrf.mxu0  ;;  %v4246_v38 = vpop.f32.mrf.mxu1 }
 0x2b2   :  { %v750_v39 = vpop.f32.mrf.mxu0  ;;  %v820_v40 = vpop.f32.mrf.mxu1 }
 0x2b4   :  { %v751_v43 = vpop.f32.mrf.mxu0  ;;  %v821_v44 = vpop.f32.mrf.mxu1 }
 0x2b6   :  { %v752_v45 = vpop.f32.mrf.mxu0  ;;  %v822_v46 = vpop.f32.mrf.mxu1 }
 0x2b7   :  { %v1082_v47 = vadd.f32 %v752_v45, %v748_v62 }
 0x2b8   :  { %v4248_v54 = vpop.f32.mrf.mxu0  ;;  %v825_v49 = vpop.f32.mrf.mxu1 }
 0x2b9   :  { %v4250_v52 = vadd.f32 %v1082_v47, %v825_v49 }
 0x2ba   :  { %v758_v53 = vpop.f32.mrf.mxu0  ;;  %v827_v59 = vpop.f32.mrf.mxu1 }
 0x2bc   :  { %v759_v56 = vpop.f32.mrf.mxu0  ;;  %v828_v12 = vpop.f32.mrf.mxu1 }
 0x2be   :  { %v760_v48 = vpop.f32.mrf.mxu0  ;;  %v829_v60 = vpop.f32.mrf.mxu1 }
 0x2c0   :  { %v865_v50 = vpop.f32.mrf.mxu0  ;;  %v931_v61 = vpop.f32.mrf.mxu1 }
 0x2c2   :  { %v866_v36 = vpop.f32.mrf.mxu0  ;;  %v933_v1 = vpop.f32.mrf.mxu1 }
 0x2c3   :  { %v3015_v1 = vld [vmem:[%s4840_s5] ss:$0 sm:$0xff] }
 0x2c4   :  { %v867_v5 = vpop.f32.mrf.mxu0  ;;  %v934_v63 = vpop.f32.mrf.mxu1 }
 0x2c6   :  { %v868_v8 = vpop.f32.mrf.mxu0  ;;  %v935_v57 = vpop.f32.mrf.mxu1 }
 0x2c7   :  { %v1044_v60 = vadd.f32 %v935_v57, %v931_v61 }
 0x2c8   :  { %v871_v51 = vpop.f32.mrf.mxu0  ;;  %v939_v10 = vpop.f32.mrf.mxu1 }
 0x2c9   :  { %v1062_v51 = vadd.f32 %v4240_v42, %v4242_v27  ;;  %v1050_v26 = vadd.f32 %v3015_v1, %v939_v10 }
 0x2ca   :  { %v872_v55 = vpop.f32.mrf.mxu0  ;;  %v941_v3 = vpop.f32.mrf.mxu1 }
 0x2cc   :  { %v873_v41 = vpop.f32.mrf.mxu0  ;;  %v942_v13 = vpop.f32.mrf.mxu1 }
 0x2ce   :  { %v874_v14 = vpop.f32.mrf.mxu0  ;;  %v943_v0 = vpop.f32.mrf.mxu1 }
 0x2cf   :  { %v1054_v61 = vadd.f32 %v874_v14, %v4225_v7 }
 0x2d0   :  { %v878_v18 = vpop.f32.mrf.mxu0  ;;  %v946_v11 = vpop.f32.mrf.mxu1 }
 0x2d1   :  { %v1063_v57 = vadd.f32 %v1062_v51, %v878_v18 }
 0x2d2   :  { %v880_v20 = vpop.f32.mrf.mxu0  ;;  %v947_v22 = vpop.f32.mrf.mxu1 }
 0x2d3   :  { %v1051_v22 = vmax.f32 %v1050_v26, 0.0 }
 0x2d4   :  { %v881_v19 = vpop.f32.mrf.mxu0  ;;  %v948_v23 = vpop.f32.mrf.mxu1 }
 0x2d5   :  { %v1072_v23 = vadd.f32 %v4244_v6, %v4237_v21 }
 0x2d6   :  { %v882_v24 = vpop.f32.mrf.mxu0  ;;  %v949_v25 = vpop.f32.mrf.mxu1 }
 0x2d7   :  { %v1064_v0 = vadd.f32 %v1063_v57, %v882_v24 }
 0x2d8   :  { %v886_v28 = vpop.f32.mrf.mxu0  ;;  %v952_v31 = vpop.f32.mrf.mxu1 }
 0x2d9   :  { %v1065_v25 = vadd.f32 %v1064_v0, %v952_v31  ;;  %v3053_v0 = vld [vmem:[%s4837_s3 + $0x1] ss:$0 sm:$0xff] }
 0x2da   :  { %v887_v33 = vpop.f32.mrf.mxu0  ;;  %v954_v34 = vpop.f32.mrf.mxu1 }
 0x2dc   :  { %v888_v35 = vpop.f32.mrf.mxu0  ;;  %v955_v37 = vpop.f32.mrf.mxu1 }
 0x2de   :  { %v889_v2 = vpop.f32.mrf.mxu0  ;;  %v956_v62 = vpop.f32.mrf.mxu1 }
 0x2df   :  { %v1066_v10 = vadd.f32 %v1065_v25, %v956_v62  ;;  %v1078_v2 = vadd.f32 %v3015_v1, %v4246_v38 }
 0x2e0   :  { %v892_v39 = vpop.f32.mrf.mxu0  ;;  %v960_v40 = vpop.f32.mrf.mxu1 }
 0x2e1   :  { %v1073_v33 = vadd.f32 %v1072_v23, %v960_v40  ;;  %v1079_v31 = vmax.f32 %v1078_v2, 0.0 }
 0x2e2   :  { %v893_v43 = vpop.f32.mrf.mxu0  ;;  %v962_v44 = vpop.f32.mrf.mxu1 }
 0x2e3   :  { %v1074_v24 = vadd.f32 %v3015_v1, %v1073_v33  ;;  %v1084_v44 = vadd.f32 %v3015_v1, %v4250_v52  ;;  %v3690_v52 = vld [vmem:[%s4834_s1 + $0x50] sm:$0xff]  }
 0x2e4   :  { %v894_v45 = vpop.f32.mrf.mxu0  ;;  %v963_v46 = vpop.f32.mrf.mxu1 }
 0x2e5   :  { %v1075_v21 = vmax.f32 %v1074_v24, 0.0  ;;  %v1088_v45 = vadd.f32 %v3015_v1, %v4248_v54  ;;  %v1085_v40 = vmax.f32 %v1084_v44, 0.0  ;;  %v3689_v54 = vld [vmem:[%s4834_s1 + $0x48] sm:$0xff]  }
 0x2e6   :  { %v895_v47 = vpop.f32.mrf.mxu0  ;;  %v964_v49 = vpop.f32.mrf.mxu1 }
 0x2e7   :  { %v1089_v47 = vmax.f32 %v1088_v45, 0.0 }
 0x2e8   :  { %v1000_v53 = vpop.f32.mrf.mxu0 }
 0x2e9   :  { %v1041_v4 = vadd.f32 %v3015_v1, %v1000_v53 }
 0x2ea   :  { %v3420_v59 = vpop.f32.mrf.mxu0 }
 0x2eb   :  { %v1042_v41 = vmax.f32 %v1041_v4, 0.0  ;;  %v3688_v59 = vld [vmem:[%s4834_s1 + $0x40] sm:$0xff]  }
 0x2ec   :  { %v1003_v56 = vpop.f32.mrf.mxu0 }
 0x2ed   :  { %v3691_v56 = vld [vmem:[%s4834_s1 + $0x58] sm:$0xff]  }
 0x2ee   :  { %v3421_v12 = vpop.f32.mrf.mxu0 }
 0x2ef   :  { %v3693_v12 = vld [vmem:[%s4834_s1 + $0x68] sm:$0xff]  }
 0x2f0   :  { %v1007_v32 = vpop.f32.mrf.mxu0 }
 0x2f1   :  { %v1045_v50 = vadd.f32 %v1044_v60, %v1007_v32  ;;  %v3694_v32 = vld [vmem:[%s4834_s1 + $0x70] sm:$0xff]   ;;  %v3703_v60 = vld [vmem:[%s4839_s8] sm:$0xff]  }
 0x2f2   :  { %v3424_v48 = vpop.f32.mrf.mxu0  ;;  %3473 = vmatpush3.bf16.msra.mxu0 %v3703_v60 }
 0x2f3   :  { %v1046_v5 = vadd.f32 %v3015_v1, %v1045_v50  ;;  %v3695_v48 = vld [vmem:[%s4834_s1 + $0x78] sm:$0xff]   ;;  %3496 = vmatprep.subr.bf16.mxu0 %v3783_v9 }
 0x2f4   :  { %v1010_v30 = vpop.f32.mrf.mxu0 }
 0x2f5   :  { %v1047_v55 = vmax.f32 %v1046_v5, 0.0  ;;  %v3016_v30 = vld [vmem:[%s4841_s7] ss:$0 sm:$0xff] }
 0x2f6   :  { %v3425_v36 = vpop.f32.mrf.mxu0 }
 0x2f7   :  { %v1048_v16 = vmax.f32 %v1042_v41, %v1047_v55 }
 0x2f8   :  { %v1014_v58 = vpop.f32.mrf.mxu0 }
 0x2f9   :  { %v1052_v42 = vmax.f32 %v1048_v16, %v1051_v22 }
 0x2fa   :  { %v3428_v63 = vpop.f32.mrf.mxu0 }
 0x2fc   :  { %v1016_v8 = vpop.f32.mrf.mxu0 }
 0x2fe   :  { %v3429_v3 = vpop.f32.mrf.mxu0 }
 0x300   :  { %v1020_v13 = vpop.f32.mrf.mxu0 }
 0x301   :  { %v1055_v11 = vadd.f32 %v1054_v61, %v1020_v13 }
 0x302   :  { %v3432_v20 = vpop.f32.mrf.mxu0 }
 0x303   :  { %v1056_v15 = vadd.f32 %v3015_v1, %v1055_v11 }
 0x304   :  { %v1023_v19 = vpop.f32.mrf.mxu0 }
 0x305   :  { %v1057_v27 = vmax.f32 %v1056_v15, 0.0 }
 0x306   :  { %v3433_v28 = vpop.f32.mrf.mxu0 }
 0x307   :  { %v1058_v7 = vmax.f32 %v1052_v42, %v1057_v27 }
 0x308   :  { %v1027_v14 = vpop.f32.mrf.mxu0 }
 0x309   :  { %v1067_v18 = vadd.f32 %v1066_v10, %v1027_v14 }
 0x30a   :  { %v3436_v34 = vpop.f32.mrf.mxu0 }
 0x30b   :  { %v1068_v35 = vadd.f32 %v3015_v1, %v1067_v18 }
 0x30c   :  { %v1030_v37 = vpop.f32.mrf.mxu0 }
 0x30d   :  { %v1069_v39 = vmax.f32 %v1068_v35, 0.0 }
 0x30e   :  { %v3437_v43 = vpop.f32.mrf.mxu0 }
 0x30f   :  { %v1070_v6 = vmax.f32 %v1058_v7, %v1069_v39 }
 0x311   :  { %v1076_v62 = vmax.f32 %v1070_v6, %v1075_v21 }
 0x313   :  { %v1080_v46 = vmax.f32 %v1076_v62, %v1079_v31 }
 0x315   :  { %v1086_v49 = vmax.f32 %v1080_v46, %v1085_v40 }
 0x317   :  { %v1090_v53 = vmax.f32 %v1086_v49, %v1089_v47 }
 0x319   :  { %v1091_v38 = vpack.c.bf16 %v1090_v53, %v1090_v53 }
 0x31b   :  { %3455 = vmatmul.mubr.bf16.vlgmr.msra.gmra.mxu1 %v1091_v38 }
 0x31c   :  { %3479 = vmatpush3.bf16.msra.mxu1 %v4235_v17  ;;  %3480 = vmatprep.mubr.msk.bf16.mxu1 %vm134_vm0, %v3688_v59  ;;  %v3692_v17 = vld [vmem:[%s4834_s1 + $0x60] sm:$0xff]  }
 0x323   :  { %3481 = vmatmul.mubr.msk.bf16.vlgmr.msra.gmra.mxu1 %vm134_vm0, %v3689_v54 }
 0x324   :  { %3484 = vmatprep.mubr.msk.bf16.mxu1 %vm134_vm0, %v3690_v52 }
 0x32b   :  { %3485 = vmatmul.mubr.msk.bf16.gmra.mxu1 %vm134_vm0, %v3691_v56 }
 0x32c   :  { %3488 = vmatprep.mubr.msk.bf16.mxu1 %vm134_vm0, %v3692_v17 }
 0x333   :  { %3489 = vmatmul.mubr.msk.bf16.gmra.mxu1 %vm134_vm0, %v3693_v12 }
 0x334   :  { %3492 = vmatprep.mubr.msk.bf16.mxu1 %vm134_vm0, %v3694_v32 }
 0x33b   :  { %3493 = vmatmul.mubr.msk.bf16.gmra.mxu1 %vm134_vm0, %v3695_v48 }
 0x33c   :  { %1938 = vmatprep.mubr.bf16.mxu1 %v3785_v29 }
 0x3db   :  { %v1197_v50 = vpop.f32.mrf.mxu1 }
 0x3dc   :  { %v1198_v36 = vadd.f32 %v3016_v30, %v1197_v50 }
 0x3dd   :  { %v3456_v1 = vpop.f32.mrf.mxu1 }
 0x3de   :  { %v1203_v58 = vpack.c.bf16 %v1198_v36, %v1198_v36 }
 0x3df   :  { %v1200_v5 = vpop.f32.mrf.mxu1 }
 0x3e0   :  { %3475 = vmatmul.mubr.bf16.vlgmr.msra.gmra.mxu0 %v1203_v58 }
 0x3e1   :  { %v3457_v63 = vpop.f32.mrf.mxu1  ;;  %3510 = vmatprep.mubr.msk.bf16.mxu0 %vm3784_vm1, %v3783_v9 }
 0x3e3   :  { %v3482_v4 = vpop.f32.mrf.mxu1 }
 0x3e4   :  { %v1457_v11 = vadd.f32 %v3482_v4, %v3053_v0 }
 0x3e5   :  { %v1448_v8 = vpop.f32.mrf.mxu1 }
 0x3e6   :  { %v1449_v22 = vadd.f32 %v3053_v0, %v1448_v8  ;;  %v4337_v19 = vmax.f32 %v1457_v11, 0.0 }
 0x3e7   :  { %v3483_v51 = vpop.f32.mrf.mxu1 }
 0x3e8   :  { %v1460_v23 = vadd.f32 %v3483_v51, %v3053_v0  ;;  %v4339_v7 = vmax.f32 %v1449_v22, 0.0  ;;  %v1546_v2 = vrot.slane %v4337_v19, 1 }
 0x3e9   :  { %v1451_v55 = vpop.f32.mrf.mxu1 }
 0x3ea   :  { %v4342_v39 = vmax.f32 %v1460_v23, 0.0  ;;  %v1452_v43 = vadd.f32 %v3053_v0, %v1451_v55  ;;  %v1543_v40 = vrot.slane %v4339_v7, 1 }
 0x3eb   :  { %v3486_v3 = vpop.f32.mrf.mxu1 }
 0x3ec   :  { %v1473_v27 = vadd.f32 %v3486_v3, %v3053_v0  ;;  %v1548_v52 = vrot.slane %v4342_v39, 1  ;;  %v4362_v56 = vmax.f32 %v1452_v43, 0.0 }
 0x3ed   :  { %v1464_v26 = vpop.f32.mrf.mxu1 }
 0x3ee   :  { %v1465_v28 = vadd.f32 %v3053_v0, %v1464_v26  ;;  %v4346_v21 = vmax.f32 %v1473_v27, 0.0 }
 0x3ef   :  { %v3487_v61 = vpop.f32.mrf.mxu1 }
 0x3f0   :  { %v1476_v14 = vadd.f32 %v3487_v61, %v3053_v0  ;;  %v4348_v6 = vmax.f32 %v1465_v28, 0.0  ;;  %v1554_v32 = vrot.slane %v4346_v21, 1 }
 0x3f1   :  { %v1467_v57 = vpop.f32.mrf.mxu1 }
 0x3f2   :  { %v1468_v18 = vadd.f32 %v3053_v0, %v1467_v57  ;;  %v4353_v46 = vmax.f32 %v1476_v14, 0.0  ;;  %v1550_v48 = vrot.slane %v4348_v6, 1 }
 0x3f3   :  { %v3490_v41 = vpop.f32.mrf.mxu1 }
 0x3f4   :  { %v1489_v34 = vadd.f32 %v3490_v41, %v3053_v0  ;;  %v4355_v47 = vmax.f32 %v1468_v18, 0.0  ;;  %v1556_v50 = vrot.slane %v4353_v46, 1 }
 0x3f5   :  { %v1480_v13 = vpop.f32.mrf.mxu1 }
 0x3f6   :  { %v1481_v35 = vadd.f32 %v3053_v0, %v1480_v13  ;;  %v4357_v49 = vmax.f32 %v1489_v34, 0.0  ;;  %v1552_v36 = vrot.slane %v4355_v47, 1 }
 0x3f7   :  { %v3491_v16 = vpop.f32.mrf.mxu1 }
 0x3f8   :  { %v1492_v25 = vadd.f32 %v3491_v16, %v3053_v0  ;;  %v4359_v53 = vmax.f32 %v1481_v35, 0.0  ;;  %v1562_v1 = vrot.slane %v4357_v49, 1 }
 0x3f9   :  { %v1483_v20 = vpop.f32.mrf.mxu1 }
 0x3fa   :  { %v1484_v10 = vadd.f32 %v3053_v0, %v1483_v20  ;;  %v4344_v44 = vmax.f32 %v1492_v25, 0.0  ;;  %v1558_v5 = vrot.slane %v4359_v53, 1 }
 0x3fb   :  { %v3494_v15 = vpop.f32.mrf.mxu1 }
 0x3fc   :  { %v1505_v37 = vadd.f32 %v3494_v15, %v3053_v0  ;;  %v4350_v31 = vmax.f32 %v1484_v10, 0.0  ;;  %v1564_v17 = vrot.slane %v4344_v44, 1  ;;  %v1625_v55 = vrot.slane %v4344_v44, 2 }
 0x3fd   :  { %v1496_v42 = vpop.f32.mrf.mxu1 }
 0x3fe   :  { %v1497_v33 = vadd.f32 %v3053_v0, %v1496_v42  ;;  %v1525_v59 = vmax.f32 %v1505_v37, 0.0  ;;  %v1560_v60 = vrot.slane %v4350_v31, 1  ;;  %v1565_v51 = vsel %vm288_vm2, %v1562_v1, %v1564_v17 }
 0x3ff   :  { %v3495_v24 = vpop.f32.mrf.mxu1  ;;  %v1623_v42 = vrot.slane %v4357_v49, 2  ;;  %v1599_v27 = vmax.f32 %v4357_v49, %v1565_v51 }
 0x400   :  { %v1523_v45 = vmax.f32 %v1497_v33, 0.0  ;;  %v1508_v54 = vadd.f32 %v3495_v24, %v3053_v0  ;;  %v1570_v63 = vrot.slane %v1525_v59, 1  ;;  %v1561_v61 = vsel %vm288_vm2, %v1558_v5, %v1560_v60 }
 0x401   :  { %v1499_v62 = vpop.f32.mrf.mxu1  ;;  %v1631_v57 = vrot.slane %v1525_v59, 2  ;;  %v1563_v22 = vsel %vm288_vm2, %v1560_v60, %v1562_v1  ;;  %v1621_v33 = vrot.slane %v4350_v31, 2  ;;  %v1597_v24 = vmax.f32 %v4359_v53, %v1561_v61 }
 0x402   :  { %v1566_v38 = vrot.slane %v1523_v45, 1  ;;  %v1500_v12 = vadd.f32 %v3053_v0, %v1499_v62  ;;  %v1526_v30 = vmax.f32 %v1508_v54, 0.0  ;;  %v1627_v41 = vrot.slane %v1523_v45, 2 }
 0x403   :  { %v1598_v35 = vmax.f32 %v4350_v31, %v1563_v22  ;;  %v1555_v54 = vsel %vm288_vm2, %v1552_v36, %v1554_v32  ;;  %v1624_v60 = vsel %vm350_vm3, %v1621_v33, %v1623_v42 }
 0x404   :  { %v1524_v58 = vmax.f32 %v1500_v12, 0.0  ;;  %v1567_v4 = vsel %vm288_vm2, %v1564_v17, %v1566_v38  ;;  %v1572_v8 = vrot.slane %v1526_v30, 1  ;;  %v1633_v16 = vrot.slane %v1526_v30, 2 }
 0x405   :  { %v1600_v0 = vmax.f32 %v4344_v44, %v1567_v4  ;;  %v1628_v14 = vsel %vm350_vm3, %v1625_v55, %v1627_v41  ;;  %v1559_v44 = vsel %vm288_vm2, %v1556_v50, %v1558_v5  ;;  %v1626_v12 = vsel %vm350_vm3, %v1623_v42, %v1625_v55 }
 0x406   :  { %v1568_v3 = vrot.slane %v1524_v58, 1  ;;  %v1629_v26 = vrot.slane %v1524_v58, 2  ;;  %v1573_v13 = vsel %vm288_vm2, %v1570_v63, %v1572_v8  ;;  %v1634_v43 = vsel %vm350_vm3, %v1631_v57, %v1633_v16 }
 0x407   :  { %v1603_v15 = vmax.f32 %v1525_v59, %v1573_v13  ;;  %v1661_v37 = vmax.f32 %v1600_v0, %v1628_v14  ;;  %v1557_v59 = vsel %vm288_vm2, %v1554_v32, %v1556_v50  ;;  %v1596_v1 = vmax.f32 %v4353_v46, %v1559_v44 }
 0x408   :  { %v1569_v11 = vsel %vm288_vm2, %v1566_v38, %v1568_v3  ;;  %v1571_v20 = vsel %vm288_vm2, %v1568_v3, %v1570_v63  ;;  %v1630_v28 = vsel %vm350_vm3, %v1627_v41, %v1629_v26  ;;  %v1632_v10 = vsel %vm350_vm3, %v1629_v26, %v1631_v57 }
 0x409   :  { %v1601_v23 = vmax.f32 %v1523_v45, %v1569_v11  ;;  %v1602_v25 = vmax.f32 %v1524_v58, %v1571_v20  ;;  %v1619_v45 = vrot.slane %v4359_v53, 2  ;;  %v1664_v62 = vmax.f32 %v1603_v15, %v1634_v43 }
 0x40a   :  { %v1553_v38 = vsel %vm288_vm2, %v1550_v48, %v1552_v36  ;;  %v1660_v58 = vmax.f32 %v1599_v27, %v1626_v12  ;;  %v1659_v5 = vmax.f32 %v1598_v35, %v1624_v60  ;;  %v1544_v63 = vrot.slane %v4362_v56, 1 }
 0x40b   :  { %v1662_v18 = vmax.f32 %v1601_v23, %v1630_v28  ;;  %v1663_v34 = vmax.f32 %v1602_v25, %v1632_v10  ;;  %v1622_v31 = vsel %vm350_vm3, %v1619_v45, %v1621_v33  ;;  %v1551_v50 = vsel %vm288_vm2, %v1548_v52, %v1550_v48 }
 0x40c   :  { %v1658_v53 = vmax.f32 %v1597_v24, %v1622_v31  ;;  %v1617_v32 = vrot.slane %v4353_v46, 2  ;;  %v1595_v4 = vmax.f32 %v4346_v21, %v1557_v59  ;;  %v1613_v8 = vrot.slane %v4355_v47, 2 }
 0x40d   :  { %v1677_v49 = vmax.f32 %v1662_v18, %v1663_v34  ;;  %v1676_v17 = vmax.f32 %v1661_v37, %v1662_v18  ;;  %v1675_v51 = vmax.f32 %v1660_v58, %v1661_v37  ;;  %v1593_v3 = vmax.f32 %v4348_v6, %v1553_v38 }
 0x40e   :  { %v1594_v26 = vmax.f32 %v4355_v47, %v1555_v54  ;;  %v1620_v61 = vsel %vm350_vm3, %v1617_v32, %v1619_v45  ;;  %v1673_v13 = vmax.f32 %v1658_v53, %v1659_v5  ;;  %v1674_v46 = vmax.f32 %v1659_v5, %v1660_v58 }
 0x40f   :  { %v1690_v30 = vmax.f32 %v1677_v49, %v1664_v62  ;;  %v1689_v55 = vmax.f32 %v1676_v17, %v1663_v34  ;;  %v1657_v41 = vmax.f32 %v1596_v1, %v1620_v61  ;;  %v1688_v48 = vmax.f32 %v1675_v51, %v1662_v18  ;;  %v3707_v51 = vld [vmem:[%s4836_s4 + $0x90] ss:$36 sps:$4 sm:$0xff]   ;;  %v3710_v61 = vld [vmem:[%s4836_s4 + $0xe0] ss:$36 sps:$4 sm:$0xff]  }
 0x410   :  { %v1549_v0 = vsel %vm288_vm2, %v1546_v2, %v1548_v52  ;;  %v1545_v16 = vsel %vm288_vm2, %v1543_v40, %v1544_v63  ;;  %v1615_v47 = vrot.slane %v4346_v21, 2  ;;  %v1611_v11 = vrot.slane %v4348_v6, 2 }
 0x411   :  { %v1697_v36 = vpack.c.bf16 %v1690_v30, %v1690_v30  ;;  %v1547_v20 = vsel %vm288_vm2, %v1544_v63, %v1546_v2  ;;  %v1696_v22 = vpack.c.bf16 %v1689_v55, %v1688_v48  ;;  %v1687_v15 = vmax.f32 %v1674_v46, %v1661_v37  ;;  %v3780_v48 = vld [vmem:[%s4835_s0 + $0x10] sm:$0xff]   ;;  %v3782_v46 = vld [vmem:[%s4835_s0 + $0x20] ss:$0 sps:$4 sm:$0xff]  }
 0x412   :  { %v1672_v23 = vmax.f32 %v1657_v41, %v1658_v53  ;;  %v1592_v25 = vmax.f32 %v4342_v39, %v1551_v50  ;;  %v1618_v52 = vsel %vm350_vm3, %v1615_v47, %v1617_v32  ;;  %v1614_v42 = vsel %vm350_vm3, %v1611_v11, %v1613_v8 }
 0x413   :  { %v1699_v57 = vsel %vm484_vm4, %v1697_v36, 0  ;;  %v1616_v40 = vsel %vm350_vm3, %v1613_v8, %v1615_v47  ;;  %v1656_v21 = vmax.f32 %v1595_v4, %v1618_v52  ;;  %v1654_v27 = vmax.f32 %v1593_v3, %v1614_v42  ;;  %v3709_v36 = vld [vmem:[%s4836_s4 + $0x94] ss:$36 sps:$4 sm:$0xff]   ;;  %v3712_v3 = vld [vmem:[%s4836_s4 + $0xe4] ss:$36 sps:$4 sm:$0xff]  }
 0x414   :  { %3497 = vmatpush3.bf16.msra.mxu0 %v1699_v57  ;;  %v1655_v6 = vmax.f32 %v1594_v26, %v1616_v40  ;;  %v1686_v28 = vmax.f32 %v1673_v13, %v1660_v58  ;;  %v1609_v10 = vrot.slane %v4342_v39, 2  ;;  %v1605_v2 = vrot.slane %v4362_v56, 2  ;;  %v3778_v57 = vld [vmem:[%s4835_s0] sm:$0xff]   ;;  %v3781_v13 = vld [vmem:[%s4835_s0 + $0x18] sm:$0xff]   ;;  %v3718_v47 = vld [vmem:[%s4836_s4 + $0xec] ss:$36 sps:$4 sm:$0xff]  }
 0x415   :  { %3498 = vmatprep.subr.bf16.mxu0 %v3783_v9  ;;  %v1671_v14 = vmax.f32 %v1656_v21, %v1657_v41  ;;  %v1685_v18 = vmax.f32 %v1672_v23, %v1659_v5  ;;  %v1591_v34 = vmax.f32 %v4337_v19, %v1549_v0  ;;  %v1589_v24 = vmax.f32 %v4339_v7, %v1545_v16  ;;  %v3706_v5 = vld [vmem:[%s4836_s4 + $0xdc] ss:$36 sps:$4 sm:$0xff]  }
 0x416   :  { %v1695_v33 = vpack.c.bf16 %v1687_v15, %v1686_v28  ;;  %v1590_v35 = vmax.f32 %v4362_v56, %v1547_v20  ;;  %v1612_v37 = vsel %vm350_vm3, %v1609_v10, %v1611_v11  ;;  %v1669_v45 = vmax.f32 %v1654_v27, %v1655_v6  ;;  %1918 = vmatprep.subr.bf16.mxu1 %v3706_v5  ;;  %v3713_v0 = vld [vmem:[%s4836_s4 + $0x98] ss:$36 sps:$4 sm:$0xff]   ;;  %v3025_v20 = vld [vmem:[%s4842_s9] ss:$0 sm:$0xff]  ;;  %v3721_v28 = vld [vmem:[%s4836_s4 + $0xa4] ss:$36 sps:$4 sm:$0xff]  }
 0x417   :  { %v1653_v43 = vmax.f32 %v1592_v25, %v1612_v37  ;;  %v1684_v44 = vmax.f32 %v1671_v14, %v1658_v53  ;;  %v1670_v39 = vmax.f32 %v1655_v6, %v1656_v21  ;;  %v1607_v62 = vrot.slane %v4337_v19, 2  ;;  %v3704_v53 = vld [vmem:[%s4836_s4 + $0xd8] ss:$36 sps:$4 sm:$0xff]   ;;  %v3733_v5 = vld [vmem:[%s4838_s6 + $0x60] sm:$0xff]  }
 0x418   :  { %3499 = vmatpush3.bf16.msra.mxu0 %v1696_v22  ;;  %v1604_v49 = vrot.slane %v4339_v7, 2  ;;  %v1682_v1 = vmax.f32 %v1669_v45, %v1656_v21  ;;  %1919 = vmatpush1.bf16.msra.mxu1 %v3704_v53  ;;  %v3715_v16 = vld [vmem:[%s4836_s4 + $0x9c] ss:$36 sps:$4 sm:$0xff]   ;;  %v3724_v11 = vld [vmem:[%s4836_s4 + $0xf4] ss:$36 sps:$4 sm:$0xff]   ;;  %v3732_v53 = vld [vmem:[%s4838_s6 + $0x68] sm:$0xff]  }
 0x419   :  { %3500 = vmatprep.subr.bf16.mxu0 %v3783_v9  ;;  %v1694_v59 = vpack.c.bf16 %v1685_v18, %v1684_v44  ;;  %v1683_v38 = vmax.f32 %v1670_v39, %v1657_v41  ;;  %v1668_v54 = vmax.f32 %v1653_v43, %v1654_v27  ;;  %v1610_v17 = vsel %vm350_vm3, %v1607_v62, %v1609_v10  ;;  %v3779_v41 = vld [vmem:[%s4835_s0 + $0x8] sm:$0xff]   ;;  %v3719_v18 = vld [vmem:[%s4836_s4 + $0xa0] ss:$36 sps:$4 sm:$0xff]  }
 0x41a   :  { %v1606_v56 = vsel %vm350_vm3, %v1604_v49, %v1605_v2  ;;  %v1608_v12 = vsel %vm350_vm3, %v1605_v2, %v1607_v62  ;;  %v1652_v31 = vmax.f32 %v1591_v34, %v1610_v17  ;;  %1920 = vmatprep.subr.bf16.mxu1 %v3709_v36  ;;  %v3722_v2 = vld [vmem:[%s4836_s4 + $0xf0] ss:$36 sps:$4 sm:$0xff]  }
 0x41b   :  { %v1650_v60 = vmax.f32 %v1589_v24, %v1606_v56  ;;  %v1651_v30 = vmax.f32 %v1590_v35, %v1608_v12  ;;  %v1693_v19 = vpack.c.bf16 %v1683_v38, %v1682_v1  ;;  %v1681_v58 = vmax.f32 %v1668_v54, %v1655_v6  ;;  %v3725_v24 = vld [vmem:[%s4836_s4 + $0xa8] ss:$36 sps:$4 sm:$0xff]   ;;  %v3735_v36 = vld [vmem:[%s4838_s6 + $0x50] sm:$0xff]  }
 0x41c   :  { %3501 = vmatpush3.bf16.msra.mxu0 %v1695_v33  ;;  %v1667_v7 = vmax.f32 %v1652_v31, %v1653_v43  ;;  %1921 = vmatpush1.bf16.msra.mxu1 %v3707_v51  ;;  %v3727_v33 = vld [vmem:[%s4836_s4 + $0xac] ss:$36 sps:$4 sm:$0xff]  }
 0x41d   :  { %3502 = vmatprep.subr.bf16.mxu0 %v3783_v9  ;;  %v1665_v63 = vmax.f32 %v1650_v60, %v1651_v30  ;;  %v1666_v50 = vmax.f32 %v1651_v30, %v1652_v31  ;;  %2056 = vmatprep.subr.bf16.mxu1 %v3718_v47  ;;  %v3736_v51 = vld [vmem:[%s4838_s6 + $0x48] sm:$0xff]  }
 0x41e   :  { %v1680_v32 = vmax.f32 %v1667_v7, %v1654_v27  ;;  %v3716_v27 = vld [vmem:[%s4836_s4 + $0xe8] ss:$36 sps:$4 sm:$0xff]   ;;  %v3729_v7 = vld [vmem:[%s4836_s4 + $0xb0] ss:$36 sps:$4 sm:$0xff]  }
 0x41f   :  { %v1679_v8 = vmax.f32 %v1666_v50, %v1653_v43  ;;  %v1678_v55 = vmax.f32 %v1665_v63, %v1652_v31  ;;  %v3734_v63 = vld [vmem:[%s4838_s6 + $0x58] sm:$0xff]   ;;  %v3740_v47 = vld [vmem:[%s4839_s8 + $0x68] sm:$0xff]  }
 0x420   :  { %3503 = vmatpush3.bf16.msra.mxu0 %v1694_v59  ;;  %v1692_v4 = vpack.c.bf16 %v1681_v58, %v1680_v32  ;;  %v3731_v58 = vld [vmem:[%s4838_s6 + $0x70] sm:$0xff]  }
 0x421   :  { %3504 = vmatprep.subr.bf16.mxu0 %v3783_v9  ;;  %v1691_v26 = vpack.c.bf16 %v1679_v8, %v1678_v55  ;;  %v3738_v55 = vld [vmem:[%s4839_s8 + $0x78] sm:$0xff]  }
 0x424   :  { %3505 = vmatpush3.bf16.msra.mxu0 %v1693_v19  ;;  %v3728_v19 = vld [vmem:[%s4836_s4 + $0xf8] ss:$36 sps:$4 sm:$0xff]  }
 0x425   :  { %3506 = vmatprep.subr.bf16.mxu0 %v3783_v9 }
 0x428   :  { %3507 = vmatpush3.bf16.msra.mxu0 %v1692_v4 }
 0x429   :  { %3508 = vmatprep.subr.bf16.mxu0 %v3783_v9 }
 0x42c   :  { %3509 = vmatpush3.bf16.msra.mxu0 %v1691_v26 }
 0x42d   :  { %1987 = vmatprep.subr.bf16.mxu0 %v3712_v3 }
 0x42f   :  { %3511 = vmatmul.mubr.msk.bf16.vlgmr.msra.gmra.mxu0 %vm468_vm5, %v3778_v57 }
 0x430   :  { %3514 = vmatprep.mubr.msk.bf16.mxu0 %vm3784_vm1, %v3783_v9  ;;  %1988 = vmatpush1.bf16.msra.mxu0 %v3710_v61  ;;  %v3739_v61 = vld [vmem:[%s4839_s8 + $0x70] sm:$0xff]  }
 0x431   :  { %1989 = vmatprep.subr.bf16.mxu0 %v3715_v16 }
 0x434   :  { %1990 = vmatpush1.bf16.msra.mxu0 %v3713_v0 }
 0x435   :  { %2122 = vmatprep.subr.bf16.mxu0 %v3724_v11 }
 0x437   :  { %3515 = vmatmul.mubr.msk.bf16.gmra.mxu0 %vm468_vm5, %v3779_v41 }
 0x438   :  { %3518 = vmatprep.mubr.msk.bf16.mxu0 %vm3784_vm1, %v3783_v9 }
 0x43f   :  { %3519 = vmatmul.mubr.msk.bf16.gmra.mxu0 %vm468_vm5, %v3780_v48 }
 0x440   :  { %3522 = vmatprep.mubr.msk.bf16.mxu0 %vm3784_vm1, %v3783_v9 }
 0x447   :  { %3523 = vmatmul.mubr.msk.bf16.gmra.mxu0 %vm468_vm5, %v3781_v13  ;;  %v3737_v13 = vld [vmem:[%s4838_s6 + $0x40] sm:$0xff]  }
 0x448   :  { %3526 = vmatprep.mubr.msk.bf16.mxu0 %vm3784_vm1, %v3783_v9 }
 0x44f   :  { %3527 = vmatmul.mubr.msk.bf16.gmra.mxu0 %vm468_vm5, %v3782_v46 }
 0x450   :  { %2007 = vmatprep.mubr.bf16.mxu0 %v3785_v29 }
 0x4a0   :  { %v1309_v22 = vpop.f32.mrf.mxu0 }
 0x4a1   :  { %v4506_v15 = vadd.f32 %v3025_v20, %v1309_v22 }
 0x4a2   :  { %v3476_v23 = vpop.f32.mrf.mxu0 }
 0x4a3   :  { %1315 = vst [vmem:[%s4843_s16] sm:$0xff] %v4506_v15 }
 0x4a4   :  { %v1312_v25 = vpop.f32.mrf.mxu0 }
 0x4a5   :  { %v3741_v25 = vld [vmem:[%s4839_s8 + $0x60] sm:$0xff]  }
 0x4a6   :  { %v3477_v52 = vpop.f32.mrf.mxu0 }
 0x4ef   :  { %v1735_v42 = vpop.f32.mrf.mxu0 }
 0x4f1   :  { %v3512_v40 = vpop.f32.mrf.mxu0 }
 0x4f3   :  { %v1738_v21 = vpop.f32.mrf.mxu0 }
 0x4f4   :  { %v4515_v6 = vpack.c.bf16 %v1738_v21, %v1735_v42 }
 0x4f5   :  { %v3513_v10 = vpop.f32.mrf.mxu0 }
 0x4f6   :  { %3114 = vmatmul.mubr.msk.bf16.vlgmr.msra.gmra.mxu1 %vm677_vm6, %v4515_v6  ;;  %3119 = vmatmul.mubr.msk.bf16.vlgmr.msra.gmra.mxu0 %vm677_vm6, %v4515_v6 }
 0x4f7   :  { %2057 = vmatpush1.bf16.msra.mxu1 %v3716_v27  ;;  %v1743_v14 = vpop.f32.mrf.mxu0  ;;  %1946 = vmatprep.mubr.bf16.mxu1 %v3785_v29 }
 0x4f8   :  { %2014 = vmatprep.mubr.bf16.mxu0 %v3785_v29  ;;  %2058 = vmatprep.subr.bf16.mxu1 %v3721_v28 }
 0x4f9   :  { %v3516_v34 = vpop.f32.mrf.mxu0  ;;  %2123 = vmatpush1.bf16.msra.mxu0 %v3722_v2 }
 0x4fa   :  { %2124 = vmatprep.subr.bf16.mxu0 %v3727_v33 }
 0x4fb   :  { %v1746_v35 = vpop.f32.mrf.mxu0  ;;  %2059 = vmatpush1.bf16.msra.mxu1 %v3719_v18 }
 0x4fc   :  { %v4538_v37 = vpack.c.bf16 %v1746_v35, %v1743_v14  ;;  %3530 = vmatprep.subr.bf16.mxu1 %v3783_v9  ;;  %v3743_v14 = vld [vmem:[%s4839_s8 + $0x50] sm:$0xff]  }
 0x4fd   :  { %v3517_v43 = vpop.f32.mrf.mxu0  ;;  %2125 = vmatpush1.bf16.msra.mxu0 %v3725_v24 }
 0x4fe   :  { %3115 = vmatmul.mubr.msk.bf16.gmra.mxu1 %vm677_vm6, %v4538_v37  ;;  %3120 = vmatmul.mubr.msk.bf16.gmra.mxu0 %vm677_vm6, %v4538_v37  ;;  %v3744_v43 = vld [vmem:[%s4839_s8 + $0x48] sm:$0xff]  }
 0x4ff   :  { %v1751_v44 = vpop.f32.mrf.mxu0  ;;  %1953 = vmatprep.mubr.bf16.mxu1 %v3785_v29  ;;  %2022 = vmatprep.mubr.bf16.mxu0 %v3785_v29 }
 0x500   :  { %3554 = vmatprep.subr.bf16.mxu0 %v3783_v9 }
 0x501   :  { %v3520_v45 = vpop.f32.mrf.mxu0 }
 0x503   :  { %v1754_v39 = vpop.f32.mrf.mxu0 }
 0x504   :  { %v1775_v62 = vpack.c.bf16 %v1754_v39, %v1751_v44 }
 0x505   :  { %v3521_v49 = vpop.f32.mrf.mxu0 }
 0x506   :  { %3116 = vmatmul.mubr.msk.bf16.gmra.mxu1 %vm677_vm6, %v1775_v62  ;;  %3121 = vmatmul.mubr.msk.bf16.gmra.mxu0 %vm677_vm6, %v1775_v62 }
 0x507   :  { %v1759_v59 = vpop.f32.mrf.mxu0  ;;  %1959 = vmatprep.mubr.bf16.mxu1 %v3785_v29  ;;  %2029 = vmatprep.mubr.bf16.mxu0 %v3785_v29 }
 0x509   :  { %v3524_v38 = vpop.f32.mrf.mxu0 }
 0x50b   :  { %v1762_v54 = vpop.f32.mrf.mxu0 }
 0x50c   :  { %v1776_v17 = vpack.c.bf16 %v1762_v54, %v1759_v59 }
 0x50d   :  { %v3525_v56 = vpop.f32.mrf.mxu0 }
 0x50e   :  { %3117 = vmatmul.mubr.msk.bf16.gmra.mxu1 %vm677_vm6, %v1776_v17  ;;  %3122 = vmatmul.mubr.msk.bf16.gmra.mxu0 %vm677_vm6, %v1776_v17 }
 0x50f   :  { %v1767_v12 = vpop.f32.mrf.mxu0  ;;  %1967 = vmatprep.mubr.bf16.mxu1 %v3785_v29  ;;  %2036 = vmatprep.mubr.bf16.mxu0 %v3785_v29 }
 0x510   :  { %v1777_v60 = vpack.c.bf16 %v1767_v12, %v1767_v12 }
 0x511   :  { %v3528_v31 = vpop.f32.mrf.mxu0 }
 0x513   :  { %v1770_v30 = vpop.f32.mrf.mxu0 }
 0x515   :  { %v3529_v1 = vpop.f32.mrf.mxu0 }
 0x516   :  { %3118 = vmatmul.mubr.msk.bf16.gmra.mxu1 %vm677_vm6, %v1777_v60  ;;  %3123 = vmatmul.mubr.msk.bf16.gmra.mxu0 %vm677_vm6, %v1777_v60 }
 0x517   :  { %2076 = vmatprep.mubr.bf16.mxu1 %v3785_v29  ;;  %2142 = vmatprep.mubr.bf16.mxu0 %v3785_v29 }
 0x51e   :  { %3124 = vmatmul.mubr.msk.bf16.vlgmr.msra.gmra.mxu1 %vm677_vm6, %v4515_v6  ;;  %3129 = vmatmul.mubr.msk.bf16.vlgmr.msra.gmra.mxu0 %vm677_vm6, %v4515_v6 }
 0x51f   :  { %3531 = vmatpush3.bf16.msra.mxu1 %v3728_v19  ;;  %2082 = vmatprep.mubr.bf16.mxu1 %v3785_v29 }
 0x520   :  { %2150 = vmatprep.mubr.bf16.mxu0 %v3785_v29  ;;  %3532 = vmatprep.subr.bf16.mxu1 %v3783_v9 }
 0x523   :  { %3533 = vmatpush3.bf16.msra.mxu1 %v3729_v7 }
 0x524   :  { %3574 = vmatprep.subr.bf16.mxu1 %v3783_v9 }
 0x526   :  { %3125 = vmatmul.mubr.msk.bf16.gmra.mxu1 %vm677_vm6, %v4538_v37  ;;  %3130 = vmatmul.mubr.msk.bf16.gmra.mxu0 %vm677_vm6, %v4538_v37 }
 0x527   :  { %2089 = vmatprep.mubr.bf16.mxu1 %v3785_v29  ;;  %2157 = vmatprep.mubr.bf16.mxu0 %v3785_v29 }
 0x52e   :  { %3126 = vmatmul.mubr.msk.bf16.gmra.mxu1 %vm677_vm6, %v1775_v62  ;;  %3131 = vmatmul.mubr.msk.bf16.gmra.mxu0 %vm677_vm6, %v1775_v62 }
 0x52f   :  { %2097 = vmatprep.mubr.bf16.mxu1 %v3785_v29  ;;  %2163 = vmatprep.mubr.bf16.mxu0 %v3785_v29 }
 0x536   :  { %3127 = vmatmul.mubr.msk.bf16.gmra.mxu1 %vm677_vm6, %v1776_v17  ;;  %3132 = vmatmul.mubr.msk.bf16.gmra.mxu0 %vm677_vm6, %v1776_v17 }
 0x537   :  { %2103 = vmatprep.mubr.bf16.mxu1 %v3785_v29  ;;  %2171 = vmatprep.mubr.bf16.mxu0 %v3785_v29  ;;  %v3730_v29 = vld [vmem:[%s4838_s6 + $0x78] sm:$0xff]  }
 0x538   :  { %3555 = vmatpush3.bf16.msra.mxu0 %v3730_v29 }
 0x539   :  { %3556 = vmatprep.subr.bf16.mxu0 %v3783_v9 }
 0x53c   :  { %3557 = vmatpush3.bf16.msra.mxu0 %v3731_v58 }
 0x53d   :  { %3558 = vmatprep.subr.bf16.mxu0 %v3783_v9 }
 0x53e   :  { %3128 = vmatmul.mubr.msk.bf16.gmra.mxu1 %vm677_vm6, %v1777_v60  ;;  %3133 = vmatmul.mubr.msk.bf16.gmra.mxu0 %vm677_vm6, %v1777_v60 }
 0x53f   :  { %3534 = vmatprep.mubr.msk.bf16.mxu1 %vm3784_vm1, %v3783_v9  ;;  %3570 = vmatprep.mubr.msk.bf16.mxu0 %vm3784_vm1, %v3783_v9 }
 0x540   :  { %3559 = vmatpush3.bf16.msra.mxu0 %v3732_v53 }
 0x541   :  { %3560 = vmatprep.subr.bf16.mxu0 %v3783_v9 }
 0x544   :  { %3561 = vmatpush3.bf16.msra.mxu0 %v3733_v5 }
 0x545   :  { %3562 = vmatprep.subr.bf16.mxu0 %v3783_v9 }
 0x546   :  { %3535 = vmatmul.mubr.msk.bf16.vlgmr.msra.gmra.mxu1 %vm677_vm6, %v4515_v6  ;;  %v3742_v6 = vld [vmem:[%s4839_s8 + $0x58] sm:$0xff]  }
 0x547   :  { %3538 = vmatprep.mubr.msk.bf16.mxu1 %vm3784_vm1, %v3783_v9  ;;  %3575 = vmatpush3.bf16.msra.mxu1 %v3738_v55 }
 0x548   :  { %3563 = vmatpush3.bf16.msra.mxu0 %v3734_v63  ;;  %3576 = vmatprep.subr.bf16.mxu1 %v3783_v9 }
 0x549   :  { %3564 = vmatprep.subr.bf16.mxu0 %v3783_v9 }
 0x54b   :  { %3577 = vmatpush3.bf16.msra.mxu1 %v3739_v61 }
 0x54c   :  { %3565 = vmatpush3.bf16.msra.mxu0 %v3735_v36  ;;  %3578 = vmatprep.subr.bf16.mxu1 %v3783_v9 }
 0x54d   :  { %3566 = vmatprep.subr.bf16.mxu0 %v3783_v9 }
 0x54e   :  { %3539 = vmatmul.mubr.msk.bf16.gmra.mxu1 %vm677_vm6, %v4538_v37 }
 0x54f   :  { %3542 = vmatprep.mubr.msk.bf16.mxu1 %vm3784_vm1, %v3783_v9  ;;  %3579 = vmatpush3.bf16.msra.mxu1 %v3740_v47 }
 0x550   :  { %3567 = vmatpush3.bf16.msra.mxu0 %v3736_v51  ;;  %3580 = vmatprep.subr.bf16.mxu1 %v3783_v9 }
 0x551   :  { %3568 = vmatprep.subr.bf16.mxu0 %v3783_v9 }
 0x553   :  { %3581 = vmatpush3.bf16.msra.mxu1 %v3741_v25 }
 0x554   :  { %3569 = vmatpush3.bf16.msra.mxu0 %v3737_v13  ;;  %3582 = vmatprep.subr.bf16.mxu1 %v3783_v9 }
 0x556   :  { %3543 = vmatmul.mubr.msk.bf16.gmra.mxu1 %vm677_vm6, %v1775_v62 }
 0x557   :  { %3546 = vmatprep.mubr.msk.bf16.mxu1 %vm3784_vm1, %v3783_v9  ;;  %3583 = vmatpush3.bf16.msra.mxu1 %v3742_v6 }
 0x558   :  { %3584 = vmatprep.subr.bf16.mxu1 %v3783_v9 }
 0x55b   :  { %3585 = vmatpush3.bf16.msra.mxu1 %v3743_v14 }
 0x55c   :  { %3586 = vmatprep.subr.bf16.mxu1 %v3783_v9 }
 0x55e   :  { %3547 = vmatmul.mubr.msk.bf16.gmra.mxu1 %vm677_vm6, %v1776_v17 }
 0x55f   :  { %3550 = vmatprep.mubr.msk.bf16.mxu1 %vm3784_vm1, %v3783_v9  ;;  %3587 = vmatpush3.bf16.msra.mxu1 %v3744_v43 }
 0x560   :  { %3588 = vmatprep.subr.bf16.mxu1 %v3783_v9 }
 0x566   :  { %3551 = vmatmul.mubr.msk.bf16.gmra.mxu1 %vm677_vm6, %v1777_v60 }
 0x567   :  { %3590 = vmatprep.mubr.msk.bf16.mxu1 %vm3784_vm1, %v3783_v9 }
 0x5b6   :  { %v1940_v50 = vpop.f32.mrf.mxu1  ;;  %v4631_v32 = vpop.f32.mrf.mxu0 }
 0x5b8   :  { %v1942_v4 = vpop.f32.mrf.mxu1  ;;  %v2011_v8 = vpop.f32.mrf.mxu0 }
 0x5ba   :  { %v1943_v3 = vpop.f32.mrf.mxu1  ;;  %v2012_v26 = vpop.f32.mrf.mxu0 }
 0x5bc   :  { %v1944_v57 = vpop.f32.mrf.mxu1  ;;  %v2013_v41 = vpop.f32.mrf.mxu0 }
 0x5bd   :  { %v2274_v48 = vadd.f32 %v1944_v57, %v1940_v50 }
 0x5be   :  { %v1948_v46 = vpop.f32.mrf.mxu1  ;;  %v2016_v0 = vpop.f32.mrf.mxu0 }
 0x5bf   :  { %v2275_v16 = vadd.f32 %v2274_v48, %v2016_v0 }
 0x5c0   :  { %v1950_v11 = vpop.f32.mrf.mxu1  ;;  %v2018_v20 = vpop.f32.mrf.mxu0 }
 0x5c2   :  { %v1951_v22 = vpop.f32.mrf.mxu1  ;;  %v2019_v23 = vpop.f32.mrf.mxu0 }
 0x5c4   :  { %v1952_v52 = vpop.f32.mrf.mxu1  ;;  %v2020_v42 = vpop.f32.mrf.mxu0 }
 0x5c5   :  { %v4659_v40 = vadd.f32 %v2275_v16, %v2020_v42 }
 0x5c6   :  { %v1955_v21 = vpop.f32.mrf.mxu1  ;;  %v2024_v27 = vpop.f32.mrf.mxu0 }
 0x5c8   :  { %v1956_v28 = vpop.f32.mrf.mxu1  ;;  %v2025_v10 = vpop.f32.mrf.mxu0 }
 0x5ca   :  { %v1957_v2 = vpop.f32.mrf.mxu1  ;;  %v2026_v33 = vpop.f32.mrf.mxu0 }
 0x5cc   :  { %v1958_v18 = vpop.f32.mrf.mxu1  ;;  %v2027_v34 = vpop.f32.mrf.mxu0 }
 0x5cd   :  { %v4669_v24 = vadd.f32 %v2027_v34, %v1948_v46 }
 0x5ce   :  { %v1961_v35 = vpop.f32.mrf.mxu1  ;;  %v4671_v37 = vpop.f32.mrf.mxu0 }
 0x5d0   :  { %v1963_v44 = vpop.f32.mrf.mxu1  ;;  %v2033_v45 = vpop.f32.mrf.mxu0 }
 0x5d2   :  { %v1964_v39 = vpop.f32.mrf.mxu1  ;;  %v2034_v62 = vpop.f32.mrf.mxu0 }
 0x5d4   :  { %v1965_v49 = vpop.f32.mrf.mxu1  ;;  %v2035_v59 = vpop.f32.mrf.mxu0 }
 0x5d5   :  { %v2296_v38 = vadd.f32 %v1965_v49, %v1961_v35 }
 0x5d6   :  { %v4678_v54 = vpop.f32.mrf.mxu1  ;;  %v2038_v17 = vpop.f32.mrf.mxu0 }
 0x5d7   :  { %v4680_v56 = vadd.f32 %v2296_v38, %v2038_v17 }
 0x5d8   :  { %v1971_v12 = vpop.f32.mrf.mxu1  ;;  %v2040_v31 = vpop.f32.mrf.mxu0 }
 0x5d9   :  { %v3140_v12 = vld [vmem:[%s4840_s5 + $0x1] ss:$0 sm:$0xff] }
 0x5da   :  { %v1972_v60 = vpop.f32.mrf.mxu1  ;;  %v2041_v30 = vpop.f32.mrf.mxu0 }
 0x5dc   :  { %v1973_v1 = vpop.f32.mrf.mxu1  ;;  %v2042_v19 = vpop.f32.mrf.mxu0 }
 0x5de   :  { %v2078_v7 = vpop.f32.mrf.mxu1  ;;  %v2144_v29 = vpop.f32.mrf.mxu0 }
 0x5e0   :  { %v2079_v58 = vpop.f32.mrf.mxu1  ;;  %v2146_v53 = vpop.f32.mrf.mxu0 }
 0x5e2   :  { %v2080_v5 = vpop.f32.mrf.mxu1  ;;  %v2147_v63 = vpop.f32.mrf.mxu0 }
 0x5e4   :  { %v2081_v50 = vpop.f32.mrf.mxu1  ;;  %v2148_v36 = vpop.f32.mrf.mxu0 }
 0x5e5   :  { %v2258_v49 = vadd.f32 %v2148_v36, %v2144_v29 }
 0x5e6   :  { %v2084_v4 = vpop.f32.mrf.mxu1  ;;  %v2152_v8 = vpop.f32.mrf.mxu0 }
 0x5e7   :  { %v2264_v53 = vadd.f32 %v3140_v12, %v2152_v8 }
 0x5e8   :  { %v2085_v51 = vpop.f32.mrf.mxu1  ;;  %v2154_v55 = vpop.f32.mrf.mxu0 }
 0x5ea   :  { %v2086_v3 = vpop.f32.mrf.mxu1  ;;  %v2155_v26 = vpop.f32.mrf.mxu0 }
 0x5eb   :  { %v2265_v3 = vmax.f32 %v2264_v53, 0.0  ;;  %v3760_v53 = vld [vmem:[%s4844_s10 + $0x40] sm:$0xff]  }
 0x5ec   :  { %v2087_v61 = vpop.f32.mrf.mxu1  ;;  %v2156_v57 = vpop.f32.mrf.mxu0 }
 0x5ed   :  { %v2268_v5 = vadd.f32 %v2087_v61, %v4631_v32 }
 0x5ee   :  { %v2091_v41 = vpop.f32.mrf.mxu1  ;;  %v2159_v48 = vpop.f32.mrf.mxu0 }
 0x5ef   :  { %v2277_v63 = vadd.f32 %v4659_v40, %v2091_v41 }
 0x5f0   :  { %v2093_v13 = vpop.f32.mrf.mxu1  ;;  %v2160_v46 = vpop.f32.mrf.mxu0 }
 0x5f2   :  { %v2094_v0 = vpop.f32.mrf.mxu1  ;;  %v2161_v16 = vpop.f32.mrf.mxu0 }
 0x5f4   :  { %v2095_v47 = vpop.f32.mrf.mxu1  ;;  %v2162_v11 = vpop.f32.mrf.mxu0 }
 0x5f5   :  { %v2278_v36 = vadd.f32 %v2277_v63, %v2095_v47  ;;  %v3762_v63 = vld [vmem:[%s4845_s12 + $0x38] sm:$0xff]  }
 0x5f6   :  { %v2099_v20 = vpop.f32.mrf.mxu1  ;;  %v2165_v22 = vpop.f32.mrf.mxu0 }
 0x5f7   :  { %v2279_v48 = vadd.f32 %v2278_v36, %v2165_v22  ;;  %v3765_v36 = vld [vmem:[%s4845_s12 + $0x20] sm:$0xff]  }
 0x5f8   :  { %v2100_v23 = vpop.f32.mrf.mxu1  ;;  %v2167_v25 = vpop.f32.mrf.mxu0 }
 0x5f9   :  { %v2292_v23 = vadd.f32 %v3140_v12, %v4671_v37  ;;  %v3745_v37 = vld [vmem:[%s4839_s8 + $0x40] sm:$0xff]  }
 0x5fa   :  { %v2101_v52 = vpop.f32.mrf.mxu1  ;;  %v2168_v42 = vpop.f32.mrf.mxu0  ;;  %3589 = vmatpush3.bf16.msra.mxu1 %v3745_v37 }
 0x5fb   :  { %v2298_v42 = vadd.f32 %v3140_v12, %v4680_v56  ;;  %3594 = vmatprep.subr.bf16.mxu1 %v3783_v9  ;;  %v3746_v56 = vld [vmem:[%s4844_s10 + $0x78] sm:$0xff]  }
 0x5fc   :  { %v2102_v21 = vpop.f32.mrf.mxu1  ;;  %v2169_v27 = vpop.f32.mrf.mxu0  ;;  %3322 = vmatprep.subr.bf16.mxu0 %v3746_v56 }
 0x5fd   :  { %v2280_v16 = vadd.f32 %v2279_v48, %v2169_v27  ;;  %v2302_v27 = vadd.f32 %v3140_v12, %v4678_v54  ;;  %v3747_v54 = vld [vmem:[%s4844_s10 + $0x38] sm:$0xff]   ;;  %v2535_v48 = vpack.c.bf16 %v4506_v15, %v4506_v15  ;;  %v3769_v15 = vld [vmem:[%s4845_s12] sm:$0xff]  }
 0x5fe   :  { %v2105_v6 = vpop.f32.mrf.mxu1  ;;  %v2173_v28 = vpop.f32.mrf.mxu0 }
 0x5ff   :  { %v2287_v8 = vadd.f32 %v4669_v24, %v2173_v28  ;;  %v2293_v6 = vmax.f32 %v2292_v23, 0.0  ;;  %v2299_v24 = vmax.f32 %v2298_v42, 0.0 }
 0x600   :  { %v2106_v10 = vpop.f32.mrf.mxu1  ;;  %v2175_v2 = vpop.f32.mrf.mxu0 }
 0x601   :  { %v2288_v41 = vadd.f32 %v3140_v12, %v2287_v8  ;;  %v2303_v2 = vmax.f32 %v2302_v27, 0.0  ;;  %v3770_v8 = vld [vmem:[%s4846_s14 + $0x38] sm:$0xff]   ;;  %v3776_v27 = vld [vmem:[%s4846_s14 + $0x8] sm:$0xff]  }
 0x602   :  { %v2107_v33 = vpop.f32.mrf.mxu1  ;;  %v2176_v14 = vpop.f32.mrf.mxu0 }
 0x603   :  { %v2289_v22 = vmax.f32 %v2288_v41, 0.0  ;;  %v3775_v41 = vld [vmem:[%s4846_s14 + $0x10] sm:$0xff]  }
 0x604   :  { %v2108_v18 = vpop.f32.mrf.mxu1  ;;  %v2177_v34 = vpop.f32.mrf.mxu0 }
 0x605   :  { %v3748_v34 = vld [vmem:[%s4844_s10 + $0x70] sm:$0xff]  }
 0x606   :  { %v2213_v35 = vpop.f32.mrf.mxu1 }
 0x607   :  { %v2255_v1 = vadd.f32 %v3140_v12, %v2213_v35  ;;  %v3749_v35 = vld [vmem:[%s4844_s10 + $0x30] sm:$0xff]  }
 0x608   :  { %v3536_v43 = vpop.f32.mrf.mxu1 }
 0x609   :  { %v2256_v29 = vmax.f32 %v2255_v1, 0.0  ;;  %v3750_v43 = vld [vmem:[%s4844_s10 + $0x68] sm:$0xff]  }
 0x60a   :  { %v2216_v44 = vpop.f32.mrf.mxu1 }
 0x60b   :  { %v3751_v44 = vld [vmem:[%s4844_s10 + $0x28] sm:$0xff]  }
 0x60c   :  { %v3537_v45 = vpop.f32.mrf.mxu1 }
 0x60d   :  { %v3752_v45 = vld [vmem:[%s4844_s10 + $0x60] sm:$0xff]  }
 0x60e   :  { %v2220_v39 = vpop.f32.mrf.mxu1 }
 0x60f   :  { %v2259_v38 = vadd.f32 %v2258_v49, %v2220_v39  ;;  %v3753_v39 = vld [vmem:[%s4844_s10 + $0x20] sm:$0xff]   ;;  %v3755_v49 = vld [vmem:[%s4844_s10 + $0x18] sm:$0xff]  }
 0x610   :  { %v3540_v62 = vpop.f32.mrf.mxu1 }
 0x611   :  { %v2260_v60 = vadd.f32 %v3140_v12, %v2259_v38  ;;  %v3754_v62 = vld [vmem:[%s4844_s10 + $0x58] sm:$0xff]   ;;  %v3757_v38 = vld [vmem:[%s4844_s10 + $0x10] sm:$0xff]  }
 0x612   :  { %v2223_v59 = vpop.f32.mrf.mxu1 }
 0x613   :  { %v2261_v7 = vmax.f32 %v2260_v60, 0.0  ;;  %v3756_v59 = vld [vmem:[%s4844_s10 + $0x50] sm:$0xff]  }
 0x614   :  { %v3541_v17 = vpop.f32.mrf.mxu1 }
 0x615   :  { %v2262_v4 = vmax.f32 %v2256_v29, %v2261_v7  ;;  %v3758_v17 = vld [vmem:[%s4844_s10 + $0x48] sm:$0xff]   ;;  %v3763_v29 = vld [vmem:[%s4845_s12 + $0x30] sm:$0xff]  }
 0x616   :  { %v2227_v31 = vpop.f32.mrf.mxu1 }
 0x617   :  { %v2266_v13 = vmax.f32 %v2262_v4, %v2265_v3  ;;  %v3158_v31 = vld [vmem:[%s4841_s7 + $0x1] ss:$0 sm:$0xff]  ;;  %v3766_v4 = vld [vmem:[%s4845_s12 + $0x18] sm:$0xff]  }
 0x618   :  { %v3544_v30 = vpop.f32.mrf.mxu1 }
 0x61a   :  { %v2229_v19 = vpop.f32.mrf.mxu1 }
 0x61c   :  { %v3545_v58 = vpop.f32.mrf.mxu1 }
 0x61e   :  { %v2233_v50 = vpop.f32.mrf.mxu1 }
 0x61f   :  { %v2269_v51 = vadd.f32 %v2268_v5, %v2233_v50  ;;  %v3761_v5 = vld [vmem:[%s4844_s10] sm:$0xff]   ;;  %v3764_v50 = vld [vmem:[%s4845_s12 + $0x28] sm:$0xff]  }
 0x620   :  { %v3548_v55 = vpop.f32.mrf.mxu1 }
 0x621   :  { %v2270_v26 = vadd.f32 %v3140_v12, %v2269_v51  ;;  %v3184_v51 = vld [vmem:[%s4842_s9 + $0x1] ss:$0 sm:$0xff] }
 0x622   :  { %v2236_v57 = vpop.f32.mrf.mxu1 }
 0x623   :  { %v2271_v46 = vmax.f32 %v2270_v26, 0.0 }
 0x624   :  { %v3549_v0 = vpop.f32.mrf.mxu1 }
 0x625   :  { %v2272_v11 = vmax.f32 %v2266_v13, %v2271_v46  ;;  %v3767_v0 = vld [vmem:[%s4845_s12 + $0x10] sm:$0xff]  }
 0x626   :  { %v2240_v32 = vpop.f32.mrf.mxu1 }
 0x627   :  { %v2281_v61 = vadd.f32 %v2280_v16, %v2240_v32  ;;  %v3768_v16 = vld [vmem:[%s4845_s12 + $0x8] sm:$0xff]  }
 0x628   :  { %v3552_v40 = vpop.f32.mrf.mxu1  ;;  %v3772_v32 = vld [vmem:[%s4846_s14 + $0x28] sm:$0xff]  }
 0x629   :  { %v2282_v20 = vadd.f32 %v3140_v12, %v2281_v61  ;;  %v3759_v12 = vld [vmem:[%s4844_s10 + $0x8] sm:$0xff]   ;;  %v3773_v61 = vld [vmem:[%s4846_s14 + $0x20] sm:$0xff]   ;;  %v3774_v40 = vld [vmem:[%s4846_s14 + $0x18] sm:$0xff]  }
 0x62a   :  { %v2243_v47 = vpop.f32.mrf.mxu1 }
 0x62b   :  { %v2283_v25 = vmax.f32 %v2282_v20, 0.0  ;;  %v3194_v47 = vld [vmem:[%s4847_s11] ss:$0 sm:$0xff] }
 0x62c   :  { %v3553_v52 = vpop.f32.mrf.mxu1 }
 0x62d   :  { %v2284_v21 = vmax.f32 %v2272_v11, %v2283_v25  ;;  %v3771_v11 = vld [vmem:[%s4846_s14 + $0x30] sm:$0xff]  }
 0x62f   :  { %v2290_v10 = vmax.f32 %v2284_v21, %v2289_v22 }
 0x631   :  { %v2294_v28 = vmax.f32 %v2290_v10, %v2293_v6  ;;  %v3777_v10 = vld [vmem:[%s4846_s14] sm:$0xff]  }
 0x633   :  { %v2300_v33 = vmax.f32 %v2294_v28, %v2299_v24  ;;  %v3211_v24 = vld [vmem:[%s4848_s13] ss:$0 sm:$0xff] }
 0x635   :  { %v2304_v14 = vmax.f32 %v2300_v33, %v2303_v2 }
 0x637   :  { %v2305_v18 = vpack.c.bf16 %v2304_v14, %v2304_v14 }
 0x639   :  { %3571 = vmatmul.mubr.bf16.vlgmr.msra.gmra.mxu0 %v2305_v18 }
 0x63a   :  { %3323 = vmatpush3.bf16.msra.mxu0 %v3747_v54  ;;  %v3220_v54 = vld [vmem:[%s4849_s15] ss:$0 sm:$0xff] }
 0x63b   :  { %3324 = vmatprep.subr.bf16.mxu0 %v3748_v34 }
 0x63e   :  { %3325 = vmatpush3.bf16.msra.mxu0 %v3749_v35 }
 0x63f   :  { %3326 = vmatprep.subr.bf16.mxu0 %v3750_v43 }
 0x642   :  { %3327 = vmatpush3.bf16.msra.mxu0 %v3751_v44 }
 0x643   :  { %3328 = vmatprep.subr.bf16.mxu0 %v3752_v45 }
 0x646   :  { %3329 = vmatpush3.bf16.msra.mxu0 %v3753_v39 }
 0x647   :  { %3330 = vmatprep.subr.bf16.mxu0 %v3754_v62 }
 0x64a   :  { %3331 = vmatpush3.bf16.msra.mxu0 %v3755_v49 }
 0x64b   :  { %3332 = vmatprep.subr.bf16.mxu0 %v3756_v59 }
 0x64e   :  { %3333 = vmatpush3.bf16.msra.mxu0 %v3757_v38 }
 0x64f   :  { %3334 = vmatprep.subr.bf16.mxu0 %v3758_v17 }
 0x652   :  { %3335 = vmatpush3.bf16.msra.mxu0 %v3759_v12 }
 0x653   :  { %3336 = vmatprep.subr.bf16.mxu0 %v3760_v53 }
 0x656   :  { %3337 = vmatpush3.bf16.msra.mxu0 %v3761_v5 }
 0x657   :  { %3614 = vmatprep.subr.bf16.mxu0 %v3783_v9 }
 0x6f9   :  { %v2413_v60 = vpop.f32.mrf.mxu0 }
 0x6fa   :  { %v2414_v30 = vadd.f32 %v3158_v31, %v2413_v60 }
 0x6fb   :  { %v3572_v1 = vpop.f32.mrf.mxu0 }
 0x6fc   :  { %v2419_v19 = vpack.c.bf16 %v2414_v30, %v2414_v30 }
 0x6fd   :  { %v2416_v7 = vpop.f32.mrf.mxu0 }
 0x6fe   :  { %3591 = vmatmul.mubr.bf16.vlgmr.msra.gmra.mxu1 %v2419_v19 }
 0x6ff   :  { %v3573_v58 = vpop.f32.mrf.mxu0  ;;  %3610 = vmatprep.mubr.msk.bf16.mxu1 %vm3784_vm1, %v3783_v9  ;;  %3595 = vmatpush3.bf16.msra.mxu1 %v3762_v63 }
 0x700   :  { %3596 = vmatprep.subr.bf16.mxu1 %v3783_v9 }
 0x703   :  { %3597 = vmatpush3.bf16.msra.mxu1 %v3763_v29 }
 0x704   :  { %3598 = vmatprep.subr.bf16.mxu1 %v3783_v9 }
 0x707   :  { %3599 = vmatpush3.bf16.msra.mxu1 %v3764_v50 }
 0x708   :  { %3600 = vmatprep.subr.bf16.mxu1 %v3783_v9 }
 0x70b   :  { %3601 = vmatpush3.bf16.msra.mxu1 %v3765_v36 }
 0x70c   :  { %3602 = vmatprep.subr.bf16.mxu1 %v3783_v9 }
 0x70f   :  { %3603 = vmatpush3.bf16.msra.mxu1 %v3766_v4 }
 0x710   :  { %3604 = vmatprep.subr.bf16.mxu1 %v3783_v9 }
 0x713   :  { %3605 = vmatpush3.bf16.msra.mxu1 %v3767_v0 }
 0x714   :  { %3606 = vmatprep.subr.bf16.mxu1 %v3783_v9 }
 0x717   :  { %3607 = vmatpush3.bf16.msra.mxu1 %v3768_v16 }
 0x718   :  { %3608 = vmatprep.subr.bf16.mxu1 %v3783_v9 }
 0x71b   :  { %3609 = vmatpush3.bf16.msra.mxu1 %v3769_v15 }
 0x7be   :  { %v2527_v55 = vpop.f32.mrf.mxu1 }
 0x7bf   :  { %v2528_v3 = vadd.f32 %v3184_v51, %v2527_v55 }
 0x7c0   :  { %v3592_v26 = vpop.f32.mrf.mxu1 }
 0x7c1   :  { %3193 = vst [vmem:[%s4843_s16 + $0x8] sm:$0xff] %v2528_v3  ;;  %v2536_v57 = vpack.c.bf16 %v2528_v3, %v2528_v3 }
 0x7c2   :  { %v2530_v13 = vpop.f32.mrf.mxu1 }
 0x7c3   :  { %2704 = vmatprep.mubr.bf16.mxu0 %v2536_v57 }
 0x7c4   :  { %v3593_v46 = vpop.f32.mrf.mxu1  ;;  %2705 = vmatmul.mubr.bf16.vlgmr.msra.gmra.mxu0 %v2535_v48 }
 0x7c5   :  { %3630 = vmatprep.mubr.msk.bf16.mxu0 %vm3784_vm1, %v3783_v9  ;;  %3615 = vmatpush3.bf16.msra.mxu0 %v3770_v8 }
 0x7c6   :  { %3616 = vmatprep.subr.bf16.mxu0 %v3783_v9 }
 0x7c9   :  { %3617 = vmatpush3.bf16.msra.mxu0 %v3771_v11 }
 0x7ca   :  { %3618 = vmatprep.subr.bf16.mxu0 %v3783_v9 }
 0x7cd   :  { %3619 = vmatpush3.bf16.msra.mxu0 %v3772_v32 }
 0x7ce   :  { %3620 = vmatprep.subr.bf16.mxu0 %v3783_v9 }
 0x7d1   :  { %3621 = vmatpush3.bf16.msra.mxu0 %v3773_v61 }
 0x7d2   :  { %3622 = vmatprep.subr.bf16.mxu0 %v3783_v9 }
 0x7d5   :  { %3623 = vmatpush3.bf16.msra.mxu0 %v3774_v40 }
 0x7d6   :  { %3624 = vmatprep.subr.bf16.mxu0 %v3783_v9 }
 0x7d9   :  { %3625 = vmatpush3.bf16.msra.mxu0 %v3775_v41 }
 0x7da   :  { %3626 = vmatprep.subr.bf16.mxu0 %v3783_v9 }
 0x7dd   :  { %3627 = vmatpush3.bf16.msra.mxu0 %v3776_v27 }
 0x7de   :  { %3628 = vmatprep.subr.bf16.mxu0 %v3783_v9 }
 0x7e1   :  { %3629 = vmatpush3.bf16.msra.mxu0 %v3777_v10 }
 0x884   :  { %v3338_v20 = vpop.f32.mrf.mxu0 }
 0x886   :  { %v3339_v23 = vpop.f32.mrf.mxu0 }
 0x887   :  { %v3340_v25 = vadd.f32 %v3339_v23, %v3338_v20 }
 0x888   :  { %v3341_v52 = vpop.f32.mrf.mxu0 }
 0x889   :  { %v2707_v42 = vadd.f32 %v3340_v25, %v3194_v47 }
 0x88a   :  { %v3342_v22 = vpop.f32.mrf.mxu0 }
 0x88b   :  { %v2712_v21 = vmax.f32 %v2707_v42, 0.0 }
 0x88d   :  { %v2713_v6 = vpack.c.bf16 %v2712_v21, %v2712_v21 }
 0x88f   :  { %3611 = vmatmul.mubr.bf16.vlgmr.msra.gmra.mxu1 %v2713_v6 }
 0x94f   :  { %v2819_v28 = vpop.f32.mrf.mxu1 }
 0x950   :  { %v2820_v2 = vadd.f32 %v3211_v24, %v2819_v28 }
 0x951   :  { %v3612_v33 = vpop.f32.mrf.mxu1 }
 0x952   :  { %v2825_v14 = vmax.f32 %v2820_v2, 0.0 }
 0x953   :  { %v2822_v18 = vpop.f32.mrf.mxu1 }
 0x954   :  { %v2826_v37 = vpack.c.bf16 %v2825_v14, %v2825_v14 }
 0x955   :  { %v3613_v56 = vpop.f32.mrf.mxu1 }
 0x956   :  { %3631 = vmatmul.mubr.bf16.vlgmr.msra.gmra.mxu0 %v2826_v37 }
 0xa16   :  { %v2932_v34 = vpop.f32.mrf.mxu0 }
 0xa17   :  { %v2933_v35 = vadd.f32 %v3220_v54, %v2932_v34 }
 0xa18   :  { %v3632_v9 = vpop.f32.mrf.mxu0 }
 0xa19   :  { %3229 = vst [vmem:[%s4843_s16 + $0x10] sm:$0xff] %v2933_v35 }
 0xa1a   :  { %v2935_v43 = vpop.f32.mrf.mxu0 }
 0xa1c   :  { %v3633_v44 = vpop.f32.mrf.mxu0 }

</bundles_post_ra>
